<compile_context>
chip_gen: v7x
topology: tpu7x:2x2x1
jax: 0.10.0
libtpu: 0.0.40
codegen_flags: <defaults>
</compile_context>

<pallas_src>
import functools
import math

import jax
import jax.numpy as jnp
from jax import lax
from jax.experimental import pallas as pl
from jax.experimental.pallas import tpu as pltpu

_TWO_PI = 2.0 * math.pi
_LN_01 = math.log(0.1)


def _round_up(x, m):
    return ((x + m - 1) // m) * m


# --------------------------------------------------------------------------
# Dunkin / Thomson-Haskell pieces (vectorised translation of surfdisp96
# dltar4 / var / dnka).  All inputs broadcast against the tile plane, so the
# same code serves both tilings:
#   pass 1: plane = (Fb, Cb), layer params are SMEM scalars
#   pass 2: plane = (Sb, F ), layer params are (Sb, 1) columns
# --------------------------------------------------------------------------
def _var(p, q, ra, rb, wvno, xka, xkb, dpth):
    """Eigenfunction products for one layer (divides hoisted, exps shared)."""
    inv_ra = 1.0 / jnp.where(ra > 0.0, ra, 1.0)
    inv_rb = 1.0 / jnp.where(rb > 0.0, rb, 1.0)

    # ----- P-wave -----
    p_osc = wvno < xka
    p_eva = wvno > xka
    sinp = jnp.sin(p)
    cosp_o = jnp.cos(p)
    pex = jnp.where(p_eva, p, 0.0)
    ep = jnp.exp(-pex)                       # shared: facp = ep*ep, a0 = ep*eq
    facp = ep * ep                           # == exp(-2p) on the evanescent branch
    cosp_e = (1.0 + facp) * 0.5
    sinp_e = (1.0 - facp) * 0.5
    cosp = jnp.where(p_osc, cosp_o, jnp.where(p_eva, cosp_e, 1.0))
    w = jnp.where(p_osc, sinp * inv_ra, jnp.where(p_eva, sinp_e * inv_ra, dpth))
    x = jnp.where(p_osc, -ra * sinp, jnp.where(p_eva, ra * sinp_e, 0.0))

    # ----- S-wave -----
    s_osc = wvno < xkb
    s_eva = wvno > xkb
    sinq = jnp.sin(q)
    cosq_o = jnp.cos(q)
    sex = jnp.where(s_eva, q, 0.0)
    eq = jnp.exp(-sex)
    facq = eq * eq
    cosq_e = (1.0 + facq) * 0.5
    sinq_e = (1.0 - facq) * 0.5
    cosq = jnp.where(s_osc, cosq_o, jnp.where(s_eva, cosq_e, 1.0))
    y = jnp.where(s_osc, sinq * inv_rb, jnp.where(s_eva, sinq_e * inv_rb, dpth))
    z = jnp.where(s_osc, -rb * sinq, jnp.where(s_eva, rb * sinq_e, 0.0))

    a0 = ep * eq
    # NOTE: the final exp(sex-pex) rescale of cosq/y/z in surfdisp96 is only
    # needed for the water-layer / Love-wave branches, which are not used here.
    return (a0, cosp * cosq, cosp * y, cosp * z, cosq * w, cosq * x,
            x * y, x * z, w * y, w * z)


def _halfspace_e(wvno, wvno2, omega, inv_omega, bh, rhoh, inv_ah, inv_bh):
    """Bottom half-space E vector."""
    xka = omega * inv_ah
    xkb = omega * inv_bh
    ra = jnp.sqrt((wvno + xka) * jnp.abs(wvno - xka))
    rb = jnp.sqrt((wvno + xkb) * jnp.abs(wvno - xkb))
    t = bh * inv_omega
    gammk = 2.0 * t * t
    gam = gammk * wvno2
    gamm1 = gam - 1.0
    rarb = ra * rb
    e0 = rhoh * rhoh * (gamm1 * gamm1 - gam * gammk * rarb)
    e1 = -rhoh * ra
    e2 = rhoh * (gamm1 - gammk * rarb)
    e3 = rhoh * rb
    e4 = wvno2 - rarb
    return (e0, e1, e2, e3, e4)


def _layer_update(e, wvno, wvno2, omega, inv_omega,
                  dm, bm, rhom, inv_am, inv_bm, inv_rhom):
    """One Dunkin layer: e <- e . CA(layer), with per-layer normalisation.

    The 5x5 CA matrix is streamed column-by-column directly into the e-vector
    contraction (shared entries computed once), keeping the live set small.
    """
    e0, e1, e2, e3, e4 = e
    xka = omega * inv_am
    xkb = omega * inv_bm
    tt = bm * inv_omega
    gammk = 2.0 * tt * tt
    gam = gammk * wvno2
    ra = jnp.sqrt((wvno + xka) * jnp.abs(wvno - xka))
    rb = jnp.sqrt((wvno + xkb) * jnp.abs(wvno - xkb))
    p = ra * dm
    q = rb * dm
    (a0, cpcq, cpy, cpz, cqw, cqx, xy, xz, wy, wz) = _var(
        p, q, ra, rb, wvno, xka, xkb, dm)

    gamm1 = gam - 1.0
    twgm1 = gam + gamm1
    gmgmk = gam * gammk
    gmgm1 = gam * gamm1
    gm1sq = gamm1 * gamm1
    rho2 = rhom * rhom
    inv_rho2 = inv_rhom * inv_rhom
    a0pq = a0 - cpcq
    t2 = -2.0 * wvno2

    ca00 = cpcq - 2.0 * gmgm1 * a0pq - gmgmk * xz - wvno2 * gm1sq * wy
    ca01 = (wvno2 * cpy - cqx) * inv_rhom
    ca02 = -(twgm1 * a0pq + gammk * xz + wvno2 * gamm1 * wy) * inv_rhom
    ca03 = (cpz - wvno2 * cqw) * inv_rhom
    ca04 = -(2.0 * wvno2 * a0pq + xz + wvno2 * wvno2 * wy) * inv_rho2
    ca10 = (gmgmk * cpz - gm1sq * cqw) * rhom
    ca12 = gammk * cpz - gamm1 * cqw
    ca22 = a0 + 2.0 * (cpcq - ca00)
    ca30 = (gm1sq * cpy - gmgmk * cqx) * rhom
    ca32 = gamm1 * cpy - gammk * cqx
    ca40 = -(2.0 * gmgmk * gm1sq * a0pq + gmgmk * gmgmk * xz
             + gm1sq * gm1sq * wy) * rho2
    ca42 = -(gmgm1 * twgm1 * a0pq + gam * gammk * gamm1 * xz
             + gamm1 * gm1sq * wy) * rhom

    # Stream the five Dunkin-matrix columns into ee[i] = sum_j e[j] * CA[j][i].
    ee0 = e0 * ca00 + e1 * ca10 + e2 * (t2 * ca42) + e3 * ca30 + e4 * ca40
    ee1 = e0 * ca01 + e1 * cpcq + e2 * (t2 * ca32) + e3 * (-xy) + e4 * ca30
    ee2 = e0 * ca02 + e1 * ca12 + e2 * ca22 + e3 * ca32 + e4 * ca42
    ee3 = e0 * ca03 + e1 * (-wz) + e2 * (t2 * ca12) + e3 * cpcq + e4 * ca10
    ee4 = e0 * ca04 + e1 * ca03 + e2 * (t2 * ca02) + e3 * ca01 + e4 * ca00

    # normc: normalise by the max |component| (one reciprocal + 5 multiplies).
    tnorm = jnp.maximum(jnp.maximum(jnp.abs(ee0), jnp.abs(ee1)),
                        jnp.maximum(jnp.abs(ee2),
                                    jnp.maximum(jnp.abs(ee3), jnp.abs(ee4))))
    tnorm = jnp.where(tnorm < 1.0e-30, 1.0, tnorm)
    # kept exact (not pl.reciprocal(approx=True)) pending a float64 tolerance check
    inv_t = 1.0 / tnorm
    return (ee0 * inv_t, ee1 * inv_t, ee2 * inv_t, ee3 * inv_t, ee4 * inv_t)


# --------------------------------------------------------------------------
# Pallas kernels
# --------------------------------------------------------------------------
def _det_minmax_kernel(d_ref, b_ref, rho_ref, ia_ref, ib_ref, irho_ref,
                       om_ref, iom_ref, invc_ref,
                       dmax_ref, dmin_ref, mx_sc, mn_sc, *, n_layer):
    """dltar_matrix + max/min over the Clist axis.

    grid = (station, period_block, c_block); the Clist axis (lanes) is the
    accumulation axis.  Layer tables are flattened 1-D SMEM arrays indexed
    with s*n_layer + m inside a lax.fori_loop over layers.
    """
    s = pl.program_id(0)
    c_idx = pl.program_id(2)
    base = s * n_layer

    omega = om_ref[0, 0]                  # (Fb, 1) periods on sublanes
    inv_omega = iom_ref[0, 0]             # (Fb, 1)
    wvno = omega * invc_ref[...]          # (Fb, Cb) Clist on the 128-wide lanes
    wvno2 = wvno * wvno

    hs = base + n_layer - 1
    e = _halfspace_e(wvno, wvno2, omega, inv_omega,
                     b_ref[hs], rho_ref[hs], ia_ref[hs], ib_ref[hs])

    def body(i, carry):
        idx = base + (n_layer - 2 - i)
        return _layer_update(carry, wvno, wvno2, omega, inv_omega,
                             d_ref[idx], b_ref[idx], rho_ref[idx],
                             ia_ref[idx], ib_ref[idx], irho_ref[idx])

    e = lax.fori_loop(0, n_layer - 1, body, e)
    det = e[0]                            # (Fb, Cb)

    cur_max = jnp.max(det, axis=-1, keepdims=True)    # (Fb, 1) lane reduce
    cur_min = jnp.min(det, axis=-1, keepdims=True)

    @pl.when(c_idx == 0)
    def _():
        mx_sc[...] = cur_max
        mn_sc[...] = cur_min

    @pl.when(c_idx > 0)
    def _():
        mx_sc[...] = jnp.maximum(mx_sc[...], cur_max)
        mn_sc[...] = jnp.minimum(mn_sc[...], cur_min)

    @pl.when(c_idx == pl.num_programs(2) - 1)
    def _():
        dmax_ref[...] = mx_sc[...][None, None, :, :]
        dmin_ref[...] = mn_sc[...][None, None, :, :]


def _e00_kernel(d_ref, b_ref, rho_ref, ia_ref, ib_ref, irho_ref,
                om_ref, iom_ref, wv_ref, dmax_ref, dmin_ref, out_ref,
                *, n_layer, n_freq, compress, normalized, compress_method):
    """dltar_vector + normalisation + compression + |.|-mean over periods.

    One grid step handles s_block=8 stations (sublanes) x all periods (lanes).
    """
    omega = om_ref[...]                   # (Sb, F)
    inv_omega = iom_ref[...]
    wvno = wv_ref[...]
    wvno2 = wvno * wvno

    d_t = d_ref[...]                      # (Sb, L) tiny per-block layer tables
    b_t = b_ref[...]
    rho_t = rho_ref[...]
    ia_t = ia_ref[...]
    ib_t = ib_ref[...]
    irho_t = irho_ref[...]

    hs = n_layer - 1
    e = _halfspace_e(wvno, wvno2, omega, inv_omega,
                     b_t[:, hs:hs + 1], rho_t[:, hs:hs + 1],
                     ia_t[:, hs:hs + 1], ib_t[:, hs:hs + 1])
    for m in range(n_layer - 2, -1, -1):
        e = _layer_update(e, wvno, wvno2, omega, inv_omega,
                          d_t[:, m:m + 1], b_t[:, m:m + 1], rho_t[:, m:m + 1],
                          ia_t[:, m:m + 1], ib_t[:, m:m + 1],
                          irho_t[:, m:m + 1])
    e00 = e[0]                            # (Sb, F)

    if compress:
        if normalized:
            # Matches the reference: no clamp, a flat determinant over Clist
            # (dmax == dmin) yields inf exactly like the PyTorch module.
            e00 = e00 / (dmax_ref[...] - dmin_ref[...])
            if compress_method == 'log':
                e00 = jnp.log(jnp.abs(e00) + 1.0)
            elif compress_method == 'exp':
                e00 = jnp.exp(jnp.abs(e00) * _LN_01) - 1.0   # 0.1**|e00| - 1
        else:
            e00 = jnp.exp(jnp.abs(e00) * _LN_01) - 1.0

    out_ref[...] = jnp.sum(jnp.abs(e00), axis=-1, keepdims=True) / float(n_freq)


# --------------------------------------------------------------------------
# Wrapper (glue in plain JAX: parameter init, reciprocal tables, padding,
# damping regularisation)
# --------------------------------------------------------------------------
def cpu_multi_cal_grad_forward(vlist, tlist, d, a, b, rho, Clist, *,
                               damp=1.0, compress=True, normalized=True,
                               compress_method='exp', initial_method='Brocher',
                               vp_vs_ratio=1.73, c_block=128, f_block=8,
                               s_block=8):
    f32 = jnp.float32
    d = d.astype(f32)
    b = b.astype(f32)
    S, L = d.shape
    F = tlist.shape[-1]
    C = Clist.shape[0]

    # ---- initial_method (tiny, plain JAX) ----
    if initial_method == 'Brocher':
        a = (0.9409 + 2.0947 * b - 0.8206 * b ** 2
             + 0.2683 * b ** 3 - 0.0251 * b ** 4)
        rho = (1.6612 * a - 0.4721 * a ** 2 + 0.0671 * a ** 3
               - 0.0043 * a ** 4 + 0.000106 * a ** 5)
    elif initial_method == 'Constant':
        a = b * vp_vs_ratio
        rho = rho.astype(f32)
    else:
        a = a.astype(f32)
        rho = rho.astype(f32)
    # TODO(synk): 'USArray' initial_method (AK135 nearest-neighbour table
    # lookup with in-place masked assignment) not ported.
    a = a.astype(f32)
    rho = rho.astype(f32)

    # Reciprocal layer tables: removes all per-layer omega/a, omega/b, /rho
    # vector divides inside the kernels.
    inv_a = 1.0 / a
    inv_b = 1.0 / b
    inv_rho = 1.0 / rho

    tlist = tlist.astype(f32).reshape(S, F)
    vlist = vlist.astype(f32).reshape(S, F)
    clist = Clist.astype(f32).reshape(C)

    # omega is clamped *before* forming any wvno (matches the reference order).
    omega = jnp.maximum(_TWO_PI / tlist, 1.0e-4)
    inv_omega = 1.0 / omega
    wvno_v = omega / vlist

    smem_spec = pl.BlockSpec(memory_space=pltpu.MemorySpace.SMEM)
    # Flattened 1-D SMEM tables (avoids the [S, L] -> [S, 128] padding blowup).
    tables_1d = tuple(x.reshape(-1) for x in (d, b, rho, inv_a, inv_b, inv_rho))

    # ---- pass 1: dltar_matrix + max/min over Clist ---------------------------
    if compress and normalized:
        fb = f_block
        cb = c_block
        F_pad = _round_up(F, fb)
        C_pad = _round_up(C, cb)
        nfb = F_pad // fb
        ncb = C_pad // cb

        # Edge padding: padded periods / Clist lanes replicate real samples so
        # they stay finite and never change the true max/min.
        om_p = jnp.pad(omega, ((0, 0), (0, F_pad - F)), mode='edge')
        iom_p = jnp.pad(inv_omega, ((0, 0), (0, F_pad - F)), mode='edge')
        om4 = om_p.reshape(S, nfb, fb, 1)
        iom4 = iom_p.reshape(S, nfb, fb, 1)
        inv_c = jnp.pad(1.0 / clist, (0, C_pad - C), mode='edge').reshape(1, C_pad)

        kernel1 = functools.partial(_det_minmax_kernel, n_layer=L)
        row_map = lambda s, f, c: (s, f, 0, 0)
        dmax4, dmin4 = pl.pallas_call(
            kernel1,
            out_shape=(jax.ShapeDtypeStruct((S, nfb, fb, 1), f32),
                       jax.ShapeDtypeStruct((S, nfb, fb, 1), f32)),
            grid_spec=pltpu.PrefetchScalarGridSpec(
                num_scalar_prefetch=0,
                grid=(S, nfb, ncb),
                in_specs=[smem_spec] * 6 + [
                    pl.BlockSpec((1, 1, fb, 1), row_map),
                    pl.BlockSpec((1, 1, fb, 1), row_map),
                    pl.BlockSpec((1, cb), lambda s, f, c: (0, c)),
                ],
                out_specs=(pl.BlockSpec((1, 1, fb, 1), row_map),
                           pl.BlockSpec((1, 1, fb, 1), row_map)),
                scratch_shapes=[pltpu.VMEM((fb, 1), f32),
                                pltpu.VMEM((fb, 1), f32)]),
            compiler_params=pltpu.CompilerParams(
                dimension_semantics=("parallel", "parallel", "arbitrary")),
        )(*tables_1d, om4, iom4, inv_c)
        dmax = dmax4.reshape(S, F_pad)[:, :F]
        dmin = dmin4.reshape(S, F_pad)[:, :F]
    else:
        dmax = jnp.ones((S, F), f32)
        dmin = jnp.zeros((S, F), f32)

    # ---- pass 2: dltar_vector + compression + mean over periods --------------
    sb = s_block
    S_pad = _round_up(S, sb)
    nsb = S_pad // sb
    pad_s = ((0, S_pad - S), (0, 0))
    d2, b2, rho2, ia2, ib2, irho2 = (
        jnp.pad(x, pad_s, mode='edge')
        for x in (d, b, rho, inv_a, inv_b, inv_rho))
    om2 = jnp.pad(omega, pad_s, mode='edge')
    iom2 = jnp.pad(inv_omega, pad_s, mode='edge')
    wv2 = jnp.pad(wvno_v, pad_s, mode='edge')
    dmax2 = jnp.pad(dmax, pad_s, mode='edge')
    dmin2 = jnp.pad(dmin, pad_s, mode='edge')

    kernel2 = functools.partial(
        _e00_kernel, n_layer=L, n_freq=F, compress=compress,
        normalized=normalized, compress_method=compress_method)
    tbl_spec = pl.BlockSpec((sb, L), lambda i: (i, 0))
    row_spec = pl.BlockSpec((sb, F), lambda i: (i, 0))
    e00_all = pl.pallas_call(
        kernel2,
        out_shape=jax.ShapeDtypeStruct((S_pad, 1), f32),
        grid_spec=pltpu.PrefetchScalarGridSpec(
            num_scalar_prefetch=0,
            grid=(nsb,),
            in_specs=[tbl_spec] * 6 + [row_spec] * 5,
            out_specs=pl.BlockSpec((sb, 1), lambda i: (i, 0))),
        compiler_params=pltpu.CompilerParams(
            dimension_semantics=("parallel",)),
    )(d2, b2, rho2, ia2, ib2, irho2, om2, iom2, wv2, dmax2, dmin2)
    e00_all = e00_all[:S, 0]

    # ---- Laplacian damping regularisation (tiny; plain JAX glue) --------------
    damp_vertical = float(damp)
    damp_horizontal = 0.0
    if damp_vertical > 0 or damp_horizontal > 0:
        Lv = (jnp.diag(2.0 * jnp.ones(L)) + jnp.diag(-jnp.ones(L - 1), 1)
              + jnp.diag(-jnp.ones(L - 1), -1))
        Lv = Lv.at[0, 0].set(1.0).at[L - 1, L - 1].set(1.0).astype(f32)
        Lh = (jnp.diag(2.0 * jnp.ones(S)) + jnp.diag(-jnp.ones(S - 1), 1)
              + jnp.diag(-jnp.ones(S - 1), -1))
        Lh = Lh.at[0, 0].set(1.0).at[S - 1, S - 1].set(1.0).astype(f32)
        m_v = damp_vertical * jnp.einsum('ij,sj->si', Lv, b) / b.shape[1]
        m_h = damp_horizontal * (Lh @ b) / b.shape[1]
        m_v = jnp.sum(jnp.abs(m_v), axis=1)
        m_h = jnp.sum(jnp.abs(m_h), axis=1)
        e_return = e00_all + m_v + m_h
    else:
        e_return = e00_all
    return e_return


# --------------------------------------------------------------------------
if __name__ == "__main__":
    key = jax.random.PRNGKey(0)
    S, L, F, C = 2, 6, 8, 32   # stations, layers, periods, Clist samples
    k1, k2, k3, k4 = jax.random.split(key, 4)

    # shear-velocity profile (km/s), increasing with depth, per station
    base_b = jnp.linspace(2.0, 3.8, L)
    b = base_b[None, :] + 0.1 * jax.random.uniform(k1, (S, L))
    d = 1.0 + 0.2 * jax.random.uniform(k2, (S, L))          # thickness (km)
    a = 1.73 * b                                            # overridden by Brocher
    rho = jnp.full((S, L), 2.5, jnp.float32)

    tlist = (jnp.broadcast_to(jnp.linspace(1.0, 8.0, F)[None, :], (S, F))
             * (1.0 + 0.01 * jax.random.uniform(k3, (S, F))))     # periods (s)
    vlist = (jnp.broadcast_to(jnp.linspace(2.0, 3.5, F)[None, :], (S, F))
             + 0.05 * jax.random.uniform(k4, (S, F)))             # phase vel (km/s)
    Clist = jnp.linspace(1.5, 4.2, C)                             # search velocities

    out = cpu_multi_cal_grad_forward(
        vlist, tlist, d, a, b, rho, Clist,
        damp=1.0, compress=True, normalized=True,
        compress_method='exp', initial_method='Brocher')
    out = jax.block_until_ready(out)

    assert out.shape == (S,), out.shape
    assert bool(jnp.all(jnp.isfinite(out)))
    print("KERNEL_OK")
</pallas_src>

<mosaic_0001>
module attributes {stable_mosaic.version = 11 : i64} {
  func.func @_det_minmax_kernel(%arg0: i32, %arg1: i32, %arg2: i32, %arg3: memref<12xf32, #tpu.memory_space<smem>>, %arg4: memref<12xf32, #tpu.memory_space<smem>>, %arg5: memref<12xf32, #tpu.memory_space<smem>>, %arg6: memref<12xf32, #tpu.memory_space<smem>>, %arg7: memref<12xf32, #tpu.memory_space<smem>>, %arg8: memref<12xf32, #tpu.memory_space<smem>>, %arg9: memref<1x1x8x1xf32, #tpu.memory_space<vmem>>, %arg10: memref<1x1x8x1xf32, #tpu.memory_space<vmem>>, %arg11: memref<1x128xf32, #tpu.memory_space<vmem>>, %arg12: memref<1x1x8x1xf32, #tpu.memory_space<vmem>>, %arg13: memref<1x1x8x1xf32, #tpu.memory_space<vmem>>, %arg14: memref<8x1xf32, #tpu.memory_space<vmem>>, %arg15: memref<8x1xf32, #tpu.memory_space<vmem>>) attributes {dimension_semantics = [#tpu.dimension_semantics<parallel>, #tpu.dimension_semantics<parallel>, #tpu.dimension_semantics<arbitrary>], iteration_bounds = array<i64: 2, 1, 1>, scalar_prefetch = 0 : i64, scratch_operands = 2 : i64, tpu.core_type = #tpu.core_type<tc>, window_params = [{transform_indices = @transform_0, window_bounds = array<i64: 12>}, {transform_indices = @transform_1, window_bounds = array<i64: 12>}, {transform_indices = @transform_2, window_bounds = array<i64: 12>}, {transform_indices = @transform_3, window_bounds = array<i64: 12>}, {transform_indices = @transform_4, window_bounds = array<i64: 12>}, {transform_indices = @transform_5, window_bounds = array<i64: 12>}, {transform_indices = @transform_6, window_bounds = array<i64: 1, 1, 8, 1>}, {transform_indices = @transform_7, window_bounds = array<i64: 1, 1, 8, 1>}, {transform_indices = @transform_8, window_bounds = array<i64: 1, 128>}, {transform_indices = @transform_9, window_bounds = array<i64: 1, 1, 8, 1>}, {transform_indices = @transform_10, window_bounds = array<i64: 1, 1, 8, 1>}]} {
    %c6_i32 = arith.constant 6 : i32
    %0 = arith.muli %arg0, %c6_i32 : i32
    %c0 = arith.constant 0 : index
    %c0_0 = arith.constant 0 : index
    %c0_1 = arith.constant 0 : index
    %c0_2 = arith.constant 0 : index
    %1 = vector.load %arg9[%c0, %c0_0, %c0_1, %c0_2] : memref<1x1x8x1xf32, #tpu.memory_space<vmem>>, vector<1x1x8x1xf32>
    %2 = vector.shape_cast %1 : vector<1x1x8x1xf32> to vector<8x1xf32>
    %c0_3 = arith.constant 0 : index
    %c0_4 = arith.constant 0 : index
    %c0_5 = arith.constant 0 : index
    %c0_6 = arith.constant 0 : index
    %3 = vector.load %arg10[%c0_3, %c0_4, %c0_5, %c0_6] : memref<1x1x8x1xf32, #tpu.memory_space<vmem>>, vector<1x1x8x1xf32>
    %4 = vector.shape_cast %3 : vector<1x1x8x1xf32> to vector<8x1xf32>
    %c0_7 = arith.constant 0 : index
    %c0_8 = arith.constant 0 : index
    %5 = vector.load %arg11[%c0_7, %c0_8] : memref<1x128xf32, #tpu.memory_space<vmem>>, vector<1x128xf32>
    %6 = vector.broadcast %2 : vector<8x1xf32> to vector<8x128xf32>
    %7 = vector.broadcast %5 : vector<1x128xf32> to vector<8x128xf32>
    %8 = arith.mulf %6, %7 : vector<8x128xf32>
    %9 = arith.mulf %8, %8 : vector<8x128xf32>
    %c6_i32_9 = arith.constant 6 : i32
    %10 = arith.addi %0, %c6_i32_9 : i32
    %c1_i32 = arith.constant 1 : i32
    %11 = arith.subi %10, %c1_i32 : i32
    %12 = arith.index_cast %11 : i32 to index
    %13 = memref.load %arg4[%12] : memref<12xf32, #tpu.memory_space<smem>>
    %14 = arith.index_cast %11 : i32 to index
    %15 = memref.load %arg5[%14] : memref<12xf32, #tpu.memory_space<smem>>
    %16 = arith.index_cast %11 : i32 to index
    %17 = memref.load %arg6[%16] : memref<12xf32, #tpu.memory_space<smem>>
    %18 = arith.index_cast %11 : i32 to index
    %19 = memref.load %arg7[%18] : memref<12xf32, #tpu.memory_space<smem>>
    %20 = vector.broadcast %17 : f32 to vector<8x1xf32>
    %21 = arith.mulf %2, %20 : vector<8x1xf32>
    %22 = vector.broadcast %19 : f32 to vector<8x1xf32>
    %23 = arith.mulf %2, %22 : vector<8x1xf32>
    %24 = vector.broadcast %21 : vector<8x1xf32> to vector<8x128xf32>
    %25 = arith.addf %8, %24 : vector<8x128xf32>
    %26 = vector.broadcast %21 : vector<8x1xf32> to vector<8x128xf32>
    %27 = arith.subf %8, %26 : vector<8x128xf32>
    %28 = math.absf %27 : vector<8x128xf32>
    %29 = arith.mulf %25, %28 : vector<8x128xf32>
    %30 = math.sqrt %29 : vector<8x128xf32>
    %31 = vector.broadcast %23 : vector<8x1xf32> to vector<8x128xf32>
    %32 = arith.addf %8, %31 : vector<8x128xf32>
    %33 = vector.broadcast %23 : vector<8x1xf32> to vector<8x128xf32>
    %34 = arith.subf %8, %33 : vector<8x128xf32>
    %35 = math.absf %34 : vector<8x128xf32>
    %36 = arith.mulf %32, %35 : vector<8x128xf32>
    %37 = math.sqrt %36 : vector<8x128xf32>
    %38 = vector.broadcast %13 : f32 to vector<8x1xf32>
    %39 = arith.mulf %38, %4 : vector<8x1xf32>
    %cst = arith.constant 2.000000e+00 : f32
    %40 = vector.broadcast %cst : f32 to vector<8x1xf32>
    %41 = arith.mulf %40, %39 : vector<8x1xf32>
    %42 = arith.mulf %41, %39 : vector<8x1xf32>
    %43 = vector.broadcast %42 : vector<8x1xf32> to vector<8x128xf32>
    %44 = arith.mulf %43, %9 : vector<8x128xf32>
    %cst_10 = arith.constant 1.000000e+00 : f32
    %45 = vector.broadcast %cst_10 : f32 to vector<8x128xf32>
    %46 = arith.subf %44, %45 : vector<8x128xf32>
    %47 = arith.mulf %30, %37 : vector<8x128xf32>
    %48 = arith.mulf %15, %15 : f32
    %49 = arith.mulf %46, %46 : vector<8x128xf32>
    %50 = vector.broadcast %42 : vector<8x1xf32> to vector<8x128xf32>
    %51 = arith.mulf %44, %50 : vector<8x128xf32>
    %52 = arith.mulf %51, %47 : vector<8x128xf32>
    %53 = arith.subf %49, %52 : vector<8x128xf32>
    %54 = vector.broadcast %48 : f32 to vector<8x128xf32>
    %55 = arith.mulf %54, %53 : vector<8x128xf32>
    %cst_11 = arith.constant 0.000000e+00 : f32
    %56 = arith.subf %cst_11, %15 : f32
    %57 = vector.broadcast %56 : f32 to vector<8x128xf32>
    %58 = arith.mulf %57, %30 : vector<8x128xf32>
    %59 = vector.broadcast %42 : vector<8x1xf32> to vector<8x128xf32>
    %60 = arith.mulf %59, %47 : vector<8x128xf32>
    %61 = arith.subf %46, %60 : vector<8x128xf32>
    %62 = vector.broadcast %15 : f32 to vector<8x128xf32>
    %63 = arith.mulf %62, %61 : vector<8x128xf32>
    %64 = vector.broadcast %15 : f32 to vector<8x128xf32>
    %65 = arith.mulf %64, %37 : vector<8x128xf32>
    %66 = arith.subf %9, %47 : vector<8x128xf32>
    %c0_i32 = arith.constant 0 : i32
    %c5_i32 = arith.constant 5 : i32
    %67 = arith.addi %c0_i32, %c5_i32 : i32
    %c1_i32_12 = arith.constant 1 : i32
    %68:5 = scf.for %arg16 = %c0_i32 to %67 step %c1_i32_12 iter_args(%arg17 = %55, %arg18 = %58, %arg19 = %63, %arg20 = %65, %arg21 = %66) -> (vector<8x128xf32>, vector<8x128xf32>, vector<8x128xf32>, vector<8x128xf32>, vector<8x128xf32>)  : i32 {
      %c4_i32 = arith.constant 4 : i32
      %82 = arith.subi %c4_i32, %arg16 : i32
      %83 = arith.addi %0, %82 : i32
      %84 = arith.index_cast %83 : i32 to index
      %85 = memref.load %arg3[%84] : memref<12xf32, #tpu.memory_space<smem>>
      %86 = arith.index_cast %83 : i32 to index
      %87 = memref.load %arg4[%86] : memref<12xf32, #tpu.memory_space<smem>>
      %88 = arith.index_cast %83 : i32 to index
      %89 = memref.load %arg5[%88] : memref<12xf32, #tpu.memory_space<smem>>
      %90 = arith.index_cast %83 : i32 to index
      %91 = memref.load %arg6[%90] : memref<12xf32, #tpu.memory_space<smem>>
      %92 = arith.index_cast %83 : i32 to index
      %93 = memref.load %arg7[%92] : memref<12xf32, #tpu.memory_space<smem>>
      %94 = arith.index_cast %83 : i32 to index
      %95 = memref.load %arg8[%94] : memref<12xf32, #tpu.memory_space<smem>>
      %96 = vector.broadcast %91 : f32 to vector<8x1xf32>
      %97 = arith.mulf %2, %96 : vector<8x1xf32>
      %98 = vector.broadcast %93 : f32 to vector<8x1xf32>
      %99 = arith.mulf %2, %98 : vector<8x1xf32>
      %100 = vector.broadcast %87 : f32 to vector<8x1xf32>
      %101 = arith.mulf %100, %4 : vector<8x1xf32>
      %cst_22 = arith.constant 2.000000e+00 : f32
      %102 = vector.broadcast %cst_22 : f32 to vector<8x1xf32>
      %103 = arith.mulf %102, %101 : vector<8x1xf32>
      %104 = arith.mulf %103, %101 : vector<8x1xf32>
      %105 = vector.broadcast %104 : vector<8x1xf32> to vector<8x128xf32>
      %106 = arith.mulf %105, %9 : vector<8x128xf32>
      %107 = vector.broadcast %97 : vector<8x1xf32> to vector<8x128xf32>
      %108 = arith.addf %8, %107 : vector<8x128xf32>
      %109 = vector.broadcast %97 : vector<8x1xf32> to vector<8x128xf32>
      %110 = arith.subf %8, %109 : vector<8x128xf32>
      %111 = math.absf %110 : vector<8x128xf32>
      %112 = arith.mulf %108, %111 : vector<8x128xf32>
      %113 = math.sqrt %112 : vector<8x128xf32>
      %114 = vector.broadcast %99 : vector<8x1xf32> to vector<8x128xf32>
      %115 = arith.addf %8, %114 : vector<8x128xf32>
      %116 = vector.broadcast %99 : vector<8x1xf32> to vector<8x128xf32>
      %117 = arith.subf %8, %116 : vector<8x128xf32>
      %118 = math.absf %117 : vector<8x128xf32>
      %119 = arith.mulf %115, %118 : vector<8x128xf32>
      %120 = math.sqrt %119 : vector<8x128xf32>
      %121 = vector.broadcast %85 : f32 to vector<8x128xf32>
      %122 = arith.mulf %113, %121 : vector<8x128xf32>
      %123 = vector.broadcast %85 : f32 to vector<8x128xf32>
      %124 = arith.mulf %120, %123 : vector<8x128xf32>
      %cst_23 = arith.constant 0.000000e+00 : f32
      %125 = vector.broadcast %cst_23 : f32 to vector<8x128xf32>
      %126 = arith.cmpf ogt, %113, %125 : vector<8x128xf32>
      %cst_24 = arith.constant 1.000000e+00 : f32
      %127 = vector.broadcast %cst_24 : f32 to vector<8x128xf32>
      %128 = arith.select %126, %113, %127 : vector<8x128xi1>, vector<8x128xf32>
      %cst_25 = arith.constant 1.000000e+00 : f32
      %129 = vector.broadcast %cst_25 : f32 to vector<8x128xf32>
      %130 = arith.divf %129, %128 : vector<8x128xf32>
      %cst_26 = arith.constant 0.000000e+00 : f32
      %131 = vector.broadcast %cst_26 : f32 to vector<8x128xf32>
      %132 = arith.cmpf ogt, %120, %131 : vector<8x128xf32>
      %cst_27 = arith.constant 1.000000e+00 : f32
      %133 = vector.broadcast %cst_27 : f32 to vector<8x128xf32>
      %134 = arith.select %132, %120, %133 : vector<8x128xi1>, vector<8x128xf32>
      %cst_28 = arith.constant 1.000000e+00 : f32
      %135 = vector.broadcast %cst_28 : f32 to vector<8x128xf32>
      %136 = arith.divf %135, %134 : vector<8x128xf32>
      %137 = vector.broadcast %97 : vector<8x1xf32> to vector<8x128xf32>
      %138 = arith.cmpf olt, %8, %137 : vector<8x128xf32>
      %139 = vector.broadcast %97 : vector<8x1xf32> to vector<8x128xf32>
      %140 = arith.cmpf ogt, %8, %139 : vector<8x128xf32>
      %141 = math.sin %122 : vector<8x128xf32>
      %142 = math.cos %122 : vector<8x128xf32>
      %cst_29 = arith.constant 0.000000e+00 : f32
      %143 = vector.broadcast %cst_29 : f32 to vector<8x128xf32>
      %144 = arith.select %140, %122, %143 : vector<8x128xi1>, vector<8x128xf32>
      %cst_30 = arith.constant 0.000000e+00 : f32
      %145 = vector.broadcast %cst_30 : f32 to vector<8x128xf32>
      %146 = arith.subf %145, %144 : vector<8x128xf32>
      %147 = math.exp %146 : vector<8x128xf32>
      %148 = arith.mulf %147, %147 : vector<8x128xf32>
      %cst_31 = arith.constant 1.000000e+00 : f32
      %149 = vector.broadcast %cst_31 : f32 to vector<8x128xf32>
      %150 = arith.addf %149, %148 : vector<8x128xf32>
      %cst_32 = arith.constant 5.000000e-01 : f32
      %151 = vector.broadcast %cst_32 : f32 to vector<8x128xf32>
      %152 = arith.mulf %150, %151 : vector<8x128xf32>
      %cst_33 = arith.constant 1.000000e+00 : f32
      %153 = vector.broadcast %cst_33 : f32 to vector<8x128xf32>
      %154 = arith.subf %153, %148 : vector<8x128xf32>
      %cst_34 = arith.constant 5.000000e-01 : f32
      %155 = vector.broadcast %cst_34 : f32 to vector<8x128xf32>
      %156 = arith.mulf %154, %155 : vector<8x128xf32>
      %cst_35 = arith.constant 1.000000e+00 : f32
      %157 = vector.broadcast %cst_35 : f32 to vector<8x128xf32>
      %158 = arith.select %140, %152, %157 : vector<8x128xi1>, vector<8x128xf32>
      %159 = arith.select %138, %142, %158 : vector<8x128xi1>, vector<8x128xf32>
      %160 = arith.mulf %141, %130 : vector<8x128xf32>
      %161 = arith.mulf %156, %130 : vector<8x128xf32>
      %162 = vector.broadcast %85 : f32 to vector<8x128xf32>
      %163 = arith.select %140, %161, %162 : vector<8x128xi1>, vector<8x128xf32>
      %164 = arith.select %138, %160, %163 : vector<8x128xi1>, vector<8x128xf32>
      %cst_36 = arith.constant 0.000000e+00 : f32
      %165 = vector.broadcast %cst_36 : f32 to vector<8x128xf32>
      %166 = arith.subf %165, %113 : vector<8x128xf32>
      %167 = arith.mulf %166, %141 : vector<8x128xf32>
      %168 = arith.mulf %113, %156 : vector<8x128xf32>
      %cst_37 = arith.constant 0.000000e+00 : f32
      %169 = vector.broadcast %cst_37 : f32 to vector<8x128xf32>
      %170 = arith.select %140, %168, %169 : vector<8x128xi1>, vector<8x128xf32>
      %171 = arith.select %138, %167, %170 : vector<8x128xi1>, vector<8x128xf32>
      %172 = vector.broadcast %99 : vector<8x1xf32> to vector<8x128xf32>
      %173 = arith.cmpf olt, %8, %172 : vector<8x128xf32>
      %174 = vector.broadcast %99 : vector<8x1xf32> to vector<8x128xf32>
      %175 = arith.cmpf ogt, %8, %174 : vector<8x128xf32>
      %176 = math.sin %124 : vector<8x128xf32>
      %177 = math.cos %124 : vector<8x128xf32>
      %cst_38 = arith.constant 0.000000e+00 : f32
      %178 = vector.broadcast %cst_38 : f32 to vector<8x128xf32>
      %179 = arith.select %175, %124, %178 : vector<8x128xi1>, vector<8x128xf32>
      %cst_39 = arith.constant 0.000000e+00 : f32
      %180 = vector.broadcast %cst_39 : f32 to vector<8x128xf32>
      %181 = arith.subf %180, %179 : vector<8x128xf32>
      %182 = math.exp %181 : vector<8x128xf32>
      %183 = arith.mulf %182, %182 : vector<8x128xf32>
      %cst_40 = arith.constant 1.000000e+00 : f32
      %184 = vector.broadcast %cst_40 : f32 to vector<8x128xf32>
      %185 = arith.addf %184, %183 : vector<8x128xf32>
      %cst_41 = arith.constant 5.000000e-01 : f32
      %186 = vector.broadcast %cst_41 : f32 to vector<8x128xf32>
      %187 = arith.mulf %185, %186 : vector<8x128xf32>
      %cst_42 = arith.constant 1.000000e+00 : f32
      %188 = vector.broadcast %cst_42 : f32 to vector<8x128xf32>
      %189 = arith.subf %188, %183 : vector<8x128xf32>
      %cst_43 = arith.constant 5.000000e-01 : f32
      %190 = vector.broadcast %cst_43 : f32 to vector<8x128xf32>
      %191 = arith.mulf %189, %190 : vector<8x128xf32>
      %cst_44 = arith.constant 1.000000e+00 : f32
      %192 = vector.broadcast %cst_44 : f32 to vector<8x128xf32>
      %193 = arith.select %175, %187, %192 : vector<8x128xi1>, vector<8x128xf32>
      %194 = arith.select %173, %177, %193 : vector<8x128xi1>, vector<8x128xf32>
      %195 = arith.mulf %176, %136 : vector<8x128xf32>
      %196 = arith.mulf %191, %136 : vector<8x128xf32>
      %197 = vector.broadcast %85 : f32 to vector<8x128xf32>
      %198 = arith.select %175, %196, %197 : vector<8x128xi1>, vector<8x128xf32>
      %199 = arith.select %173, %195, %198 : vector<8x128xi1>, vector<8x128xf32>
      %cst_45 = arith.constant 0.000000e+00 : f32
      %200 = vector.broadcast %cst_45 : f32 to vector<8x128xf32>
      %201 = arith.subf %200, %120 : vector<8x128xf32>
      %202 = arith.mulf %201, %176 : vector<8x128xf32>
      %203 = arith.mulf %120, %191 : vector<8x128xf32>
      %cst_46 = arith.constant 0.000000e+00 : f32
      %204 = vector.broadcast %cst_46 : f32 to vector<8x128xf32>
      %205 = arith.select %175, %203, %204 : vector<8x128xi1>, vector<8x128xf32>
      %206 = arith.select %173, %202, %205 : vector<8x128xi1>, vector<8x128xf32>
      %207 = arith.mulf %147, %182 : vector<8x128xf32>
      %208 = arith.mulf %159, %194 : vector<8x128xf32>
      %209 = arith.mulf %159, %199 : vector<8x128xf32>
      %210 = arith.mulf %159, %206 : vector<8x128xf32>
      %211 = arith.mulf %194, %164 : vector<8x128xf32>
      %212 = arith.mulf %194, %171 : vector<8x128xf32>
      %213 = arith.mulf %171, %199 : vector<8x128xf32>
      %214 = arith.mulf %171, %206 : vector<8x128xf32>
      %215 = arith.mulf %164, %199 : vector<8x128xf32>
      %216 = arith.mulf %164, %206 : vector<8x128xf32>
      %cst_47 = arith.constant 1.000000e+00 : f32
      %217 = vector.broadcast %cst_47 : f32 to vector<8x128xf32>
      %218 = arith.subf %106, %217 : vector<8x128xf32>
      %219 = arith.addf %106, %218 : vector<8x128xf32>
      %220 = vector.broadcast %104 : vector<8x1xf32> to vector<8x128xf32>
      %221 = arith.mulf %106, %220 : vector<8x128xf32>
      %222 = arith.mulf %106, %218 : vector<8x128xf32>
      %223 = arith.mulf %218, %218 : vector<8x128xf32>
      %224 = arith.mulf %89, %89 : f32
      %225 = arith.mulf %95, %95 : f32
      %226 = arith.subf %207, %208 : vector<8x128xf32>
      %cst_48 = arith.constant -2.000000e+00 : f32
      %227 = vector.broadcast %cst_48 : f32 to vector<8x128xf32>
      %228 = arith.mulf %227, %9 : vector<8x128xf32>
      %cst_49 = arith.constant 2.000000e+00 : f32
      %229 = vector.broadcast %cst_49 : f32 to vector<8x128xf32>
      %230 = arith.mulf %229, %222 : vector<8x128xf32>
      %231 = arith.mulf %230, %226 : vector<8x128xf32>
      %232 = arith.subf %208, %231 : vector<8x128xf32>
      %233 = arith.mulf %221, %214 : vector<8x128xf32>
      %234 = arith.subf %232, %233 : vector<8x128xf32>
      %235 = arith.mulf %9, %223 : vector<8x128xf32>
      %236 = arith.mulf %235, %215 : vector<8x128xf32>
      %237 = arith.subf %234, %236 : vector<8x128xf32>
      %238 = arith.mulf %9, %209 : vector<8x128xf32>
      %239 = arith.subf %238, %212 : vector<8x128xf32>
      %240 = vector.broadcast %95 : f32 to vector<8x128xf32>
      %241 = arith.mulf %239, %240 : vector<8x128xf32>
      %242 = arith.mulf %219, %226 : vector<8x128xf32>
      %243 = vector.broadcast %104 : vector<8x1xf32> to vector<8x128xf32>
      %244 = arith.mulf %243, %214 : vector<8x128xf32>
      %245 = arith.addf %242, %244 : vector<8x128xf32>
      %246 = arith.mulf %9, %218 : vector<8x128xf32>
      %247 = arith.mulf %246, %215 : vector<8x128xf32>
      %248 = arith.addf %245, %247 : vector<8x128xf32>
      %cst_50 = arith.constant 0.000000e+00 : f32
      %249 = vector.broadcast %cst_50 : f32 to vector<8x128xf32>
      %250 = arith.subf %249, %248 : vector<8x128xf32>
      %251 = vector.broadcast %95 : f32 to vector<8x128xf32>
      %252 = arith.mulf %250, %251 : vector<8x128xf32>
      %253 = arith.mulf %9, %211 : vector<8x128xf32>
      %254 = arith.subf %210, %253 : vector<8x128xf32>
      %255 = vector.broadcast %95 : f32 to vector<8x128xf32>
      %256 = arith.mulf %254, %255 : vector<8x128xf32>
      %cst_51 = arith.constant 2.000000e+00 : f32
      %257 = vector.broadcast %cst_51 : f32 to vector<8x128xf32>
      %258 = arith.mulf %257, %9 : vector<8x128xf32>
      %259 = arith.mulf %258, %226 : vector<8x128xf32>
      %260 = arith.addf %259, %214 : vector<8x128xf32>
      %261 = arith.mulf %9, %9 : vector<8x128xf32>
      %262 = arith.mulf %261, %215 : vector<8x128xf32>
      %263 = arith.addf %260, %262 : vector<8x128xf32>
      %cst_52 = arith.constant 0.000000e+00 : f32
      %264 = vector.broadcast %cst_52 : f32 to vector<8x128xf32>
      %265 = arith.subf %264, %263 : vector<8x128xf32>
      %266 = vector.broadcast %225 : f32 to vector<8x128xf32>
      %267 = arith.mulf %265, %266 : vector<8x128xf32>
      %268 = arith.mulf %221, %210 : vector<8x128xf32>
      %269 = arith.mulf %223, %211 : vector<8x128xf32>
      %270 = arith.subf %268, %269 : vector<8x128xf32>
      %271 = vector.broadcast %89 : f32 to vector<8x128xf32>
      %272 = arith.mulf %270, %271 : vector<8x128xf32>
      %273 = vector.broadcast %104 : vector<8x1xf32> to vector<8x128xf32>
      %274 = arith.mulf %273, %210 : vector<8x128xf32>
      %275 = arith.mulf %218, %211 : vector<8x128xf32>
      %276 = arith.subf %274, %275 : vector<8x128xf32>
      %277 = arith.subf %208, %237 : vector<8x128xf32>
      %cst_53 = arith.constant 2.000000e+00 : f32
      %278 = vector.broadcast %cst_53 : f32 to vector<8x128xf32>
      %279 = arith.mulf %278, %277 : vector<8x128xf32>
      %280 = arith.addf %207, %279 : vector<8x128xf32>
      %281 = arith.mulf %223, %209 : vector<8x128xf32>
      %282 = arith.mulf %221, %212 : vector<8x128xf32>
      %283 = arith.subf %281, %282 : vector<8x128xf32>
      %284 = vector.broadcast %89 : f32 to vector<8x128xf32>
      %285 = arith.mulf %283, %284 : vector<8x128xf32>
      %286 = arith.mulf %218, %209 : vector<8x128xf32>
      %287 = vector.broadcast %104 : vector<8x1xf32> to vector<8x128xf32>
      %288 = arith.mulf %287, %212 : vector<8x128xf32>
      %289 = arith.subf %286, %288 : vector<8x128xf32>
      %cst_54 = arith.constant 2.000000e+00 : f32
      %290 = vector.broadcast %cst_54 : f32 to vector<8x128xf32>
      %291 = arith.mulf %290, %221 : vector<8x128xf32>
      %292 = arith.mulf %291, %223 : vector<8x128xf32>
      %293 = arith.mulf %292, %226 : vector<8x128xf32>
      %294 = arith.mulf %221, %221 : vector<8x128xf32>
      %295 = arith.mulf %294, %214 : vector<8x128xf32>
      %296 = arith.addf %293, %295 : vector<8x128xf32>
      %297 = arith.mulf %223, %223 : vector<8x128xf32>
      %298 = arith.mulf %297, %215 : vector<8x128xf32>
      %299 = arith.addf %296, %298 : vector<8x128xf32>
      %cst_55 = arith.constant 0.000000e+00 : f32
      %300 = vector.broadcast %cst_55 : f32 to vector<8x128xf32>
      %301 = arith.subf %300, %299 : vector<8x128xf32>
      %302 = vector.broadcast %224 : f32 to vector<8x128xf32>
      %303 = arith.mulf %301, %302 : vector<8x128xf32>
      %304 = arith.mulf %222, %219 : vector<8x128xf32>
      %305 = arith.mulf %304, %226 : vector<8x128xf32>
      %306 = vector.broadcast %104 : vector<8x1xf32> to vector<8x128xf32>
      %307 = arith.mulf %106, %306 : vector<8x128xf32>
      %308 = arith.mulf %307, %218 : vector<8x128xf32>
      %309 = arith.mulf %308, %214 : vector<8x128xf32>
      %310 = arith.addf %305, %309 : vector<8x128xf32>
      %311 = arith.mulf %218, %223 : vector<8x128xf32>
      %312 = arith.mulf %311, %215 : vector<8x128xf32>
      %313 = arith.addf %310, %312 : vector<8x128xf32>
      %cst_56 = arith.constant 0.000000e+00 : f32
      %314 = vector.broadcast %cst_56 : f32 to vector<8x128xf32>
      %315 = arith.subf %314, %313 : vector<8x128xf32>
      %316 = vector.broadcast %89 : f32 to vector<8x128xf32>
      %317 = arith.mulf %315, %316 : vector<8x128xf32>
      %318 = arith.mulf %arg17, %237 : vector<8x128xf32>
      %319 = arith.mulf %arg18, %272 : vector<8x128xf32>
      %320 = arith.addf %318, %319 : vector<8x128xf32>
      %321 = arith.mulf %228, %317 : vector<8x128xf32>
      %322 = arith.mulf %arg19, %321 : vector<8x128xf32>
      %323 = arith.addf %320, %322 : vector<8x128xf32>
      %324 = arith.mulf %arg20, %285 : vector<8x128xf32>
      %325 = arith.addf %323, %324 : vector<8x128xf32>
      %326 = arith.mulf %arg21, %303 : vector<8x128xf32>
      %327 = arith.addf %325, %326 : vector<8x128xf32>
      %328 = arith.mulf %arg17, %241 : vector<8x128xf32>
      %329 = arith.mulf %arg18, %208 : vector<8x128xf32>
      %330 = arith.addf %328, %329 : vector<8x128xf32>
      %331 = arith.mulf %228, %289 : vector<8x128xf32>
      %332 = arith.mulf %arg19, %331 : vector<8x128xf32>
      %333 = arith.addf %330, %332 : vector<8x128xf32>
      %cst_57 = arith.constant 0.000000e+00 : f32
      %334 = vector.broadcast %cst_57 : f32 to vector<8x128xf32>
      %335 = arith.subf %334, %213 : vector<8x128xf32>
      %336 = arith.mulf %arg20, %335 : vector<8x128xf32>
      %337 = arith.addf %333, %336 : vector<8x128xf32>
      %338 = arith.mulf %arg21, %285 : vector<8x128xf32>
      %339 = arith.addf %337, %338 : vector<8x128xf32>
      %340 = arith.mulf %arg17, %252 : vector<8x128xf32>
      %341 = arith.mulf %arg18, %276 : vector<8x128xf32>
      %342 = arith.addf %340, %341 : vector<8x128xf32>
      %343 = arith.mulf %arg19, %280 : vector<8x128xf32>
      %344 = arith.addf %342, %343 : vector<8x128xf32>
      %345 = arith.mulf %arg20, %289 : vector<8x128xf32>
      %346 = arith.addf %344, %345 : vector<8x128xf32>
      %347 = arith.mulf %arg21, %317 : vector<8x128xf32>
      %348 = arith.addf %346, %347 : vector<8x128xf32>
      %349 = arith.mulf %arg17, %256 : vector<8x128xf32>
      %cst_58 = arith.constant 0.000000e+00 : f32
      %350 = vector.broadcast %cst_58 : f32 to vector<8x128xf32>
      %351 = arith.subf %350, %216 : vector<8x128xf32>
      %352 = arith.mulf %arg18, %351 : vector<8x128xf32>
      %353 = arith.addf %349, %352 : vector<8x128xf32>
      %354 = arith.mulf %228, %276 : vector<8x128xf32>
      %355 = arith.mulf %arg19, %354 : vector<8x128xf32>
      %356 = arith.addf %353, %355 : vector<8x128xf32>
      %357 = arith.mulf %arg20, %208 : vector<8x128xf32>
      %358 = arith.addf %356, %357 : vector<8x128xf32>
      %359 = arith.mulf %arg21, %272 : vector<8x128xf32>
      %360 = arith.addf %358, %359 : vector<8x128xf32>
      %361 = arith.mulf %arg17, %267 : vector<8x128xf32>
      %362 = arith.mulf %arg18, %256 : vector<8x128xf32>
      %363 = arith.addf %361, %362 : vector<8x128xf32>
      %364 = arith.mulf %228, %252 : vector<8x128xf32>
      %365 = arith.mulf %arg19, %364 : vector<8x128xf32>
      %366 = arith.addf %363, %365 : vector<8x128xf32>
      %367 = arith.mulf %arg20, %241 : vector<8x128xf32>
      %368 = arith.addf %366, %367 : vector<8x128xf32>
      %369 = arith.mulf %arg21, %237 : vector<8x128xf32>
      %370 = arith.addf %368, %369 : vector<8x128xf32>
      %371 = math.absf %327 : vector<8x128xf32>
      %372 = math.absf %339 : vector<8x128xf32>
      %373 = arith.maximumf %371, %372 : vector<8x128xf32>
      %374 = math.absf %348 : vector<8x128xf32>
      %375 = math.absf %360 : vector<8x128xf32>
      %376 = math.absf %370 : vector<8x128xf32>
      %377 = arith.maximumf %375, %376 : vector<8x128xf32>
      %378 = arith.maximumf %374, %377 : vector<8x128xf32>
      %379 = arith.maximumf %373, %378 : vector<8x128xf32>
      %cst_59 = arith.constant 1.000000e-30 : f32
      %380 = vector.broadcast %cst_59 : f32 to vector<8x128xf32>
      %381 = arith.cmpf olt, %379, %380 : vector<8x128xf32>
      %cst_60 = arith.constant 1.000000e+00 : f32
      %382 = vector.broadcast %cst_60 : f32 to vector<8x128xf32>
      %383 = arith.select %381, %382, %379 : vector<8x128xi1>, vector<8x128xf32>
      %cst_61 = arith.constant 1.000000e+00 : f32
      %384 = vector.broadcast %cst_61 : f32 to vector<8x128xf32>
      %385 = arith.divf %384, %383 : vector<8x128xf32>
      %386 = arith.mulf %327, %385 : vector<8x128xf32>
      %387 = arith.mulf %339, %385 : vector<8x128xf32>
      %388 = arith.mulf %348, %385 : vector<8x128xf32>
      %389 = arith.mulf %360, %385 : vector<8x128xf32>
      %390 = arith.mulf %370, %385 : vector<8x128xf32>
      scf.yield %386, %387, %388, %389, %390 : vector<8x128xf32>, vector<8x128xf32>, vector<8x128xf32>, vector<8x128xf32>, vector<8x128xf32>
    }
    %c5_i32_13 = arith.constant 5 : i32
    %cst_14 = arith.constant dense<0xFF800000> : vector<8xf32>
    %69 = vector.multi_reduction <maximumf>, %68#0, %cst_14 [1] : vector<8x128xf32> to vector<8xf32>
    %70 = vector.shape_cast %69 : vector<8xf32> to vector<8x1xf32>
    %cst_15 = arith.constant dense<0x7F800000> : vector<8xf32>
    %71 = vector.multi_reduction <minimumf>, %68#0, %cst_15 [1] : vector<8x128xf32> to vector<8xf32>
    %72 = vector.shape_cast %71 : vector<8xf32> to vector<8x1xf32>
    %c0_i32_16 = arith.constant 0 : i32
    %73 = arith.cmpi eq, %arg2, %c0_i32_16 : i32
    %74 = arith.extui %73 : i1 to i32
    %c0_i32_17 = arith.constant 0 : i32
    %75 = arith.cmpi ne, %74, %c0_i32_17 : i32
    scf.if %75 {
      %c0_22 = arith.constant 0 : index
      %c0_23 = arith.constant 0 : index
      %82 = vector.load %arg14[%c0_22, %c0_23] : memref<8x1xf32, #tpu.memory_space<vmem>>, vector<8x1xf32>
      tpu.vector_store %arg14[%c0_22, %c0_23], %70 {strides = array<i32>} : memref<8x1xf32, #tpu.memory_space<vmem>>, vector<8x1xf32>,
      %c0_24 = arith.constant 0 : index
      %c0_25 = arith.constant 0 : index
      %83 = vector.load %arg15[%c0_24, %c0_25] : memref<8x1xf32, #tpu.memory_space<vmem>>, vector<8x1xf32>
      tpu.vector_store %arg15[%c0_24, %c0_25], %72 {strides = array<i32>} : memref<8x1xf32, #tpu.memory_space<vmem>>, vector<8x1xf32>,
    } else {
    }
    %c0_i32_18 = arith.constant 0 : i32
    %76 = arith.cmpi sgt, %arg2, %c0_i32_18 : i32
    %77 = arith.extui %76 : i1 to i32
    %c0_i32_19 = arith.constant 0 : i32
    %78 = arith.cmpi ne, %77, %c0_i32_19 : i32
    scf.if %78 {
      %c0_22 = arith.constant 0 : index
      %c0_23 = arith.constant 0 : index
      %82 = vector.load %arg14[%c0_22, %c0_23] : memref<8x1xf32, #tpu.memory_space<vmem>>, vector<8x1xf32>
      %83 = arith.maximumf %82, %70 : vector<8x1xf32>
      %c0_24 = arith.constant 0 : index
      %c0_25 = arith.constant 0 : index
      %84 = vector.load %arg14[%c0_24, %c0_25] : memref<8x1xf32, #tpu.memory_space<vmem>>, vector<8x1xf32>
      tpu.vector_store %arg14[%c0_24, %c0_25], %83 {strides = array<i32>} : memref<8x1xf32, #tpu.memory_space<vmem>>, vector<8x1xf32>,
      %c0_26 = arith.constant 0 : index
      %c0_27 = arith.constant 0 : index
      %85 = vector.load %arg15[%c0_26, %c0_27] : memref<8x1xf32, #tpu.memory_space<vmem>>, vector<8x1xf32>
      %86 = arith.minimumf %85, %72 : vector<8x1xf32>
      %c0_28 = arith.constant 0 : index
      %c0_29 = arith.constant 0 : index
      %87 = vector.load %arg15[%c0_28, %c0_29] : memref<8x1xf32, #tpu.memory_space<vmem>>, vector<8x1xf32>
      tpu.vector_store %arg15[%c0_28, %c0_29], %86 {strides = array<i32>} : memref<8x1xf32, #tpu.memory_space<vmem>>, vector<8x1xf32>,
    } else {
    }
    %c0_i32_20 = arith.constant 0 : i32
    %79 = arith.cmpi eq, %arg2, %c0_i32_20 : i32
    %80 = arith.extui %79 : i1 to i32
    %c0_i32_21 = arith.constant 0 : i32
    %81 = arith.cmpi ne, %80, %c0_i32_21 : i32
    scf.if %81 {
      %c0_22 = arith.constant 0 : index
      %c0_23 = arith.constant 0 : index
      %82 = vector.load %arg14[%c0_22, %c0_23] : memref<8x1xf32, #tpu.memory_space<vmem>>, vector<8x1xf32>
      %83 = vector.shape_cast %82 : vector<8x1xf32> to vector<1x1x8x1xf32>
      %c0_24 = arith.constant 0 : index
      %c0_25 = arith.constant 0 : index
      %c0_26 = arith.constant 0 : index
      %c0_27 = arith.constant 0 : index
      %84 = vector.load %arg12[%c0_24, %c0_25, %c0_26, %c0_27] : memref<1x1x8x1xf32, #tpu.memory_space<vmem>>, vector<1x1x8x1xf32>
      tpu.vector_store %arg12[%c0_24, %c0_25, %c0_26, %c0_27], %83 {strides = array<i32>} : memref<1x1x8x1xf32, #tpu.memory_space<vmem>>, vector<1x1x8x1xf32>,
      %c0_28 = arith.constant 0 : index
      %c0_29 = arith.constant 0 : index
      %85 = vector.load %arg15[%c0_28, %c0_29] : memref<8x1xf32, #tpu.memory_space<vmem>>, vector<8x1xf32>
      %86 = vector.shape_cast %85 : vector<8x1xf32> to vector<1x1x8x1xf32>
      %c0_30 = arith.constant 0 : index
      %c0_31 = arith.constant 0 : index
      %c0_32 = arith.constant 0 : index
      %c0_33 = arith.constant 0 : index
      %87 = vector.load %arg13[%c0_30, %c0_31, %c0_32, %c0_33] : memref<1x1x8x1xf32, #tpu.memory_space<vmem>>, vector<1x1x8x1xf32>
      tpu.vector_store %arg13[%c0_30, %c0_31, %c0_32, %c0_33], %86 {strides = array<i32>} : memref<1x1x8x1xf32, #tpu.memory_space<vmem>>, vector<1x1x8x1xf32>,
    } else {
    }
    return
  }
  func.func @transform_0(%arg0: i32, %arg1: i32, %arg2: i32) -> i32 {
    %c0_i32 = arith.constant 0 : i32
    %c0_i32_0 = arith.constant 0 : i32
    return %c0_i32 : i32
  }
  func.func @transform_1(%arg0: i32, %arg1: i32, %arg2: i32) -> i32 {
    %c0_i32 = arith.constant 0 : i32
    %c0_i32_0 = arith.constant 0 : i32
    return %c0_i32 : i32
  }
  func.func @transform_2(%arg0: i32, %arg1: i32, %arg2: i32) -> i32 {
    %c0_i32 = arith.constant 0 : i32
    %c0_i32_0 = arith.constant 0 : i32
    return %c0_i32 : i32
  }
  func.func @transform_3(%arg0: i32, %arg1: i32, %arg2: i32) -> i32 {
    %c0_i32 = arith.constant 0 : i32
    %c0_i32_0 = arith.constant 0 : i32
    return %c0_i32 : i32
  }
  func.func @transform_4(%arg0: i32, %arg1: i32, %arg2: i32) -> i32 {
    %c0_i32 = arith.constant 0 : i32
    %c0_i32_0 = arith.constant 0 : i32
    return %c0_i32 : i32
  }
  func.func @transform_5(%arg0: i32, %arg1: i32, %arg2: i32) -> i32 {
    %c0_i32 = arith.constant 0 : i32
    %c0_i32_0 = arith.constant 0 : i32
    return %c0_i32 : i32
  }
  func.func @transform_6(%arg0: i32, %arg1: i32, %arg2: i32) -> (i32, i32, i32, i32) {
    %c0_i32 = arith.constant 0 : i32
    %c0_i32_0 = arith.constant 0 : i32
    %c0_i32_1 = arith.constant 0 : i32
    return %arg0, %arg1, %c0_i32, %c0_i32_0 : i32, i32, i32, i32
  }
  func.func @transform_7(%arg0: i32, %arg1: i32, %arg2: i32) -> (i32, i32, i32, i32) {
    %c0_i32 = arith.constant 0 : i32
    %c0_i32_0 = arith.constant 0 : i32
    %c0_i32_1 = arith.constant 0 : i32
    return %arg0, %arg1, %c0_i32, %c0_i32_0 : i32, i32, i32, i32
  }
  func.func @transform_8(%arg0: i32, %arg1: i32, %arg2: i32) -> (i32, i32) {
    %c0_i32 = arith.constant 0 : i32
    %c0_i32_0 = arith.constant 0 : i32
    return %c0_i32, %arg2 : i32, i32
  }
  func.func @transform_9(%arg0: i32, %arg1: i32, %arg2: i32) -> (i32, i32, i32, i32) {
    %c0_i32 = arith.constant 0 : i32
    %c0_i32_0 = arith.constant 0 : i32
    %c0_i32_1 = arith.constant 0 : i32
    return %arg0, %arg1, %c0_i32, %c0_i32_0 : i32, i32, i32, i32
  }
  func.func @transform_10(%arg0: i32, %arg1: i32, %arg2: i32) -> (i32, i32, i32, i32) {
    %c0_i32 = arith.constant 0 : i32
    %c0_i32_0 = arith.constant 0 : i32
    %c0_i32_1 = arith.constant 0 : i32
    return %arg0, %arg1, %c0_i32, %c0_i32_0 : i32, i32, i32, i32
  }
}

</mosaic_0001>

<bundles_post_ra>
// kernel: tpu_custom_call.1
= control target key start
LH: loop header
LB: loop body
LE: loop exit
PB: predicated region body
PF: predicated region fallthrough
CT: control target
= control target key end

     0   :  { %16 = vsyncpa [#allocation5], 0  ;;  %s2652_s0 = inlined_call_operand.vmem [shape: f32[12], index: 0, kind: input, shape index: {}]   ;;  %s2653_s1 = inlined_call_operand.vmem [shape: f32[12], index: 1, kind: input, shape index: {}]   ;;  %s2654_s2 = inlined_call_operand.vmem [shape: f32[12], index: 2, kind: input, shape index: {}]   ;;  %s2655_s3 = inlined_call_operand.vmem [shape: f32[12], index: 3, kind: input, shape index: {}]   ;;  %s2656_s4 = inlined_call_operand.vmem [shape: f32[12], index: 4, kind: input, shape index: {}]   ;;  %s2657_s5 = inlined_call_operand.vmem [shape: f32[12], index: 5, kind: input, shape index: {}]   ;;  %s2658_s6 = inlined_call_operand.vmem [shape: f32[2,1,8,1], index: 6, kind: input, shape index: {}]   ;;  %s2659_s7 = inlined_call_operand.vmem [shape: f32[2,1,8,1], index: 7, kind: input, shape index: {}]   ;;  %s2660_s8 = inlined_call_operand.vmem [shape: f32[1,128], index: 8, kind: input, shape index: {}]   ;;  %s2661_s9 = inlined_call_operand.vmem [shape: f32[2,1,8,1], index: 9, kind: output, shape index: {0}]   ;;  %s2662_s10 = inlined_call_operand.vmem [shape: f32[2,1,8,1], index: 10, kind: output, shape index: {1}]  }
   0x1   :  { %17 = vsyncpa [#allocation7], 0 }
   0x2   :  { %18 = vsyncpa [#allocation10], 0 }
   0x3   :  { %19 = vsyncpa [#allocation13], 0  ;;  %s2040_s13 = smov 0   ;;  %s2042_s14 = smov 0  }
   0x4   :  { %s2044_s15 = smov 0  }
   0x5 LB: > { %s337_s18 = sshll.u32 %s2653_s1, 4  ;;  %s1567_s19 = sadd.s32 4294967295, %s1945_s15   ;;  %s1945_s15 = sphi %s2044_s15, %s25_s15   ;;  %s1941_s14 = sphi %s2042_s14, %s2678_s14   ;;  %s1937_s13 = sphi %s2040_s13, %s2677_s13   ;;  %s338_s18 = int_to_ptr.vmem [resolvable:$true] %s337_s18 }
   0x6   : > { %p1569_p0 = scmp.ge.s32.totalorder %s1945_s15, 1  ;;  %p313_p1 = scmp.lt.s32.totalorder %s1945_s15, 3 }
   0x7   : > { %p2061_p2 = scmp.eq.s32.totalorder %s1567_s19, 0  ;;  %s359_s24 = sshll.u32 %s2655_s3, 4  ;;  %s360_s24 = int_to_ptr.vmem [resolvable:$true] %s359_s24 }
   0x8   : > { %p2065_p3 = pnand %p1569_p0, %p313_p1  ;;  %s44_s26 = sadd.s32 1, %s1941_s14 }
   0x9   : > { %s2666_s20 = scalar_select %p2061_p2, 1, 0 }
   0xa   : > { %s2667_s21 = scalar_select %p2065_p3, 1, 0 }
   0xb   : > { %p1642_p4 = pneg %p2065_p3  ;;  %s326_s29 = sshll.u32 %s2652_s0, 4  ;;  %s327_s29 = int_to_ptr.vmem [resolvable:$true] %s326_s29 }
   0xc   : > { %p2084_p6 = scmp.ge.s32.totalorder %s44_s26, 2  ;;  %s1789_s11 = scalar_lea.vmem %s338_s18, 16 }
   0xd   : > { %p2076_p5 = pnand %p2061_p2, %p1642_p4  ;;  %p1790_p7 = scmp.ne.s32.totalorder %s338_s18, %s1789_s11 }
   0xe   : > { %s2669_s30 = scalar_select %p2084_p6, 1, 0 }
   0xf   : > { %p2090_p8 = pneg %p2076_p5  ;;  %p1797_p11 = scmp.lt.s32.totalorder %s338_s18, %s338_s18 }
  0x10   : > { %p1798_p12 = scmp.lt.s32.totalorder %s1789_s11, %s1789_s11 }
  0x11   : > { %p1792_p9 = pnand %p2090_p8, %p1790_p7 }
  0x12   : > { %p1799_p13 = por %p1798_p12, %p1797_p11 }
  0x13   : > { %p1793_p10 = pneg %p1792_p9 }
  0x15   : > { %p1800_p0 = pnand %p1799_p13, %p1793_p10 }
  0x17   : > { %1803 = shalt.err (!%p1800_p0)
}
  0x18   : > { %s1971_s16 = smov [#allocation6]   ;;  %s1804_s17 = scalar_lea.vmem %s360_s24, 16 }
  0x19   : > { %1648 = dma.vmem_to_smem (!%p2076_p5), %s338_s18, 16, %s1971_s16, [#allocation7]  }
  0x1a   : > { %p1805_p1 = scmp.ne.s32.totalorder %s360_s24, %s1804_s17  ;;  %p1812_p3 = scmp.lt.s32.totalorder %s360_s24, %s360_s24 }
  0x1b   : > { %p1813_p6 = scmp.lt.s32.totalorder %s1804_s17, %s1804_s17 }
  0x1c   : > { %p1807_p4 = pnand %p1805_p1, %p2090_p8 }
  0x1d   : > { %p1814_p7 = por %p1813_p6, %p1812_p3 }
  0x1e   : > { %p1808_p2 = pneg %p1807_p4 }
  0x20   : > { %p1815_p9 = pnand %p1814_p7, %p1808_p2 }
  0x22   : > { %1818 = shalt.err (!%p1815_p9)
}
  0x23   : > { %s1972_s19 = smov [#allocation9]   ;;  %p2671_p10 = scmp.ne.s32.totalorder %s2669_s30, 0 }
  0x24   : > { %1654 = dma.vmem_to_smem (!%p2076_p5), %s360_s24, 16, %s1972_s19, [#allocation10]  }
  0x25   : > { %s2680_s26 = smov (%p2671_p10, %s44_s26), 0  ;;  %s1819_s18 = scalar_lea.vmem %s327_s29, 16 }
  0x26   : > { %p1820_p11 = scmp.ne.s32.totalorder %s327_s29, %s1819_s18  ;;  %p1827_p0 = scmp.lt.s32.totalorder %s327_s29, %s327_s29 }
  0x27   : > { %p1828_p1 = scmp.lt.s32.totalorder %s1819_s18, %s1819_s18 }
  0x28   : > { %p1822_p12 = pnand %p1820_p11, %p2090_p8 }
  0x29   : > { %p1829_p3 = por %p1828_p1, %p1827_p0 }
  0x2a   : > { %p1823_p13 = pneg %p1822_p12 }
  0x2c   : > { %p1830_p2 = pnand %p1829_p3, %p1823_p13 }
  0x2e   : > { %1833 = shalt.err (!%p1830_p2)
}
  0x2f   : > { %s1973_s22 = smov [#allocation4]   ;;  %s348_s27 = sshll.u32 %s2654_s2, 4  ;;  %s349_s27 = int_to_ptr.vmem [resolvable:$true] %s348_s27 }
  0x30   : > { %1645 = dma.vmem_to_smem (!%p2076_p5), %s327_s29, 16, %s1973_s22, [#allocation5]  }
  0x31   : > { %s370_s11 = sshll.u32 %s2656_s4, 4  ;;  %s1834_s16 = scalar_lea.vmem %s349_s27, 16  ;;  %s371_s11 = int_to_ptr.vmem [resolvable:$true] %s370_s11 }
  0x32   : > { %p1835_p6 = scmp.ne.s32.totalorder %s349_s27, %s1834_s16  ;;  %p1842_p9 = scmp.lt.s32.totalorder %s349_s27, %s349_s27 }
  0x33   : > { %p1843_p10 = scmp.lt.s32.totalorder %s1834_s16, %s1834_s16 }
  0x34   : > { %p1837_p4 = pnand %p1835_p6, %p2090_p8 }
  0x35   : > { %p1844_p11 = por %p1843_p10, %p1842_p9 }
  0x36   : > { %p1838_p7 = pneg %p1837_p4 }
  0x38   : > { %p1845_p12 = pnand %p1844_p11, %p1838_p7 }
  0x3a   : > { %1848 = shalt.err (!%p1845_p12)
}
  0x3b   : > { %s1974_s29 = smov [#allocation8]   ;;  %s1849_s17 = scalar_lea.vmem %s371_s11, 16 }
  0x3c   : > { %1651 = dma.vmem_to_smem (!%p2076_p5), %s349_s27, 16, %s1974_s29, [#allocation7]  }
  0x3d   : > { %p1850_p13 = scmp.ne.s32.totalorder %s371_s11, %s1849_s17  ;;  %p1857_p3 = scmp.lt.s32.totalorder %s371_s11, %s371_s11 }
  0x3e   : > { %p1858_p2 = scmp.lt.s32.totalorder %s1849_s17, %s1849_s17 }
  0x3f   : > { %p1852_p0 = pnand %p1850_p13, %p2090_p8 }
  0x40   : > { %p1859_p6 = por %p1858_p2, %p1857_p3 }
  0x41   : > { %p1853_p1 = pneg %p1852_p0 }
  0x43   : > { %p1860_p4 = pnand %p1859_p6, %p1853_p1 }
  0x45   : > { %1863 = shalt.err (!%p1860_p4)
}
  0x46   : > { %s1975_s19 = smov [#allocation11]   ;;  %s381_s23 = sshll.u32 %s2657_s5, 4  ;;  %s382_s23 = int_to_ptr.vmem [resolvable:$true] %s381_s23 }
  0x47   : > { %1657 = dma.vmem_to_smem (!%p2076_p5), %s371_s11, 16, %s1975_s19, [#allocation10]  }
  0x48   : > { %s1864_s24 = scalar_lea.vmem %s382_s23, 16  ;;  %p1872_p11 = scmp.lt.s32.totalorder %s382_s23, %s382_s23 }
  0x49   : > { %p1865_p7 = scmp.ne.s32.totalorder %s382_s23, %s1864_s24  ;;  %p1873_p12 = scmp.lt.s32.totalorder %s1864_s24, %s1864_s24 }
  0x4b   : > { %p1867_p9 = pnand %p1865_p7, %p2090_p8  ;;  %p1874_p13 = por %p1873_p12, %p1872_p11 }
  0x4d   : > { %p1868_p10 = pneg %p1867_p9 }
  0x4f   : > { %p1875_p0 = pnand %p1874_p13, %p1868_p10 }
  0x51   : > { %1878 = shalt.err (!%p1875_p0)
}
  0x52   : > { %s1976_s27 = smov [#allocation12]   ;;  %p2672_p1 = scmp.ne.s32.totalorder %s2667_s21, 0 }
  0x53   : > { %1660 = dma.vmem_to_smem (!%p2076_p5), %s382_s23, 16, %s1976_s27, [#allocation13]  }
  0x54   : > { %420 = sbr.rel (%p2672_p1) target bundleno = 740 (0x2e4), region = 56  ;;  %p2673_p3 = scmp.ne.s32.totalorder (!%p2672_p1), %s2666_s20, 0 }
  0x5b   : > { %1916 = dma.done.wait (%p2673_p3), [#allocation5], 16  }
  0x5c   : > { %1918 = vsyncadd (%p2673_p3), [#allocation5], 4294967280 }
  0x5d   : > { %1920 = dma.done.wait (%p2673_p3), [#allocation7], 32  }
  0x5e   : > { %1922 = vsyncadd (%p2673_p3), [#allocation7], 4294967264 }
  0x5f   : > { %1924 = dma.done.wait (%p2673_p3), [#allocation10], 32  }
  0x60   : > { %1926 = vsyncadd (%p2673_p3), [#allocation10], 4294967264 }
  0x61   : > { %1928 = dma.done.wait (%p2673_p3), [#allocation13], 16  }
  0x62   : > { %1930 = vsyncadd (%p2673_p3), [#allocation13], 4294967280 }
  0x63   : > { %446 = sfence }
  0x64   : > { %p500_p5 = scmp.lt.s32.totalorder %s1937_s13, 1  ;;  %s531_s21 = smul.u32 6, %s1937_s13  ;;  %v1977_v0 = vmov 0   ;;  %v1589_v12 = vld [vmem:[%s2660_s8] ss:$0 sm:$0xff] }
  0x65   : > { %1759 = vset.pattern.permute.xlu0 %v1977_v0  ;;  %1760 = vset.pattern.permute.xlu1 %v1977_v0  ;;  %s2217_s18 = smov 0  }
  0x66   : > { %s501_s25 = scalar_select %p500_p5, %s1937_s13, 1 }
  0x67   : > { %s2154_s12 = sadd.s32 5, %s531_s21 }
  0x68   : > { %s2156_s28 = sshll.u32 %s501_s25, 3  ;;  %s552_s23 = sld [smem:[#allocation11 + %s2154_s12]] }
  0x69   : > { %s506_s11 = scalar_lea.vmem %s2658_s6, %s2156_s28  ;;  %s523_s17 = scalar_lea.vmem %s2661_s9, %s2156_s28 }
  0x6a   : > { %s530_s22 = scalar_lea.vmem %s2662_s10, %s2156_s28  ;;  %v2170_v1 = vld [vmem:[%s506_s11] sm:$0xff]  ;;  %s551_s24 = sld [smem:[#allocation9 + %s2154_s12]] }
  0x6b   : > { %537 = vperm.xlu0 %1759, %v2170_v1   ;;  %s549_s27 = sld [smem:[#allocation6 + %s2154_s12]]  ;;  %s513_s30 = scalar_lea.vmem %s2659_s7, %s2156_s28 }
  0x6c   : > { %v2180_v3 = vld [vmem:[%s513_s30] sm:$0xff]  ;;  %s2195_s29 = sld [smem:[#allocation8 + %s2154_s12]] }
  0x6e   : > { %v555_v2 = vstv %s552_s23 }
  0x6f   : > { %v556_v4 = vmul.f32 %v555_v2, %v2170_v1 }
  0x70   : > { %v553_v5 = vstv %s551_s24 }
  0x71   : > { %v554_v6 = vmul.f32 %v553_v5, %v2170_v1  ;;  %v589_v7 = vstv %s549_s27  ;;  %575 = vperm.xlu1 %1760, %v556_v4  }
  0x72   : > { %v590_v8 = vmul.f32 %v589_v7, %v2180_v3  ;;  %s608_s19 = ssub.f32 0.0, %s2195_s29  ;;  %v613_v30 = vstv %s2195_s29  ;;  %s601_s12 = smul.f32 %s2195_s29, %s2195_s29 }
  0x73   : > { %559 = vperm.xlu0 %1759, %v554_v6  }
  0x74   : > { %v591_v9 = vmul.f32 2.0, %v590_v8  ;;  %v609_v32 = vstv %s608_s19  ;;  %v606_v48 = vstv %s601_s12 }
  0x76   : > { %v592_v10 = vmul.f32 %v591_v9, %v590_v8 }
  0x78   : > { %595 = vperm.xlu1 %1760, %v592_v10  }
  0xea   : > { %v538_v11 = vpop.permute.xlu0 %537 }
  0xeb   : > { %v2188_v13 = vmul.f32 %v1589_v12, %v538_v11 }
  0xed   : > { %v2199_v25 = vmul.f32 %v2188_v13, %v2188_v13 }
  0xf0   : > { %v576_v14 = vpop.permute.xlu1 %575 }
  0xf1   : > { %v579_v15 = vsub.f32 %v2188_v13, %v576_v14  ;;  %v578_v18 = vadd.f32 %v576_v14, %v2188_v13 }
  0xf2   : > { %v560_v16 = vpop.permute.xlu0 %559 }
  0xf3   : > { %v563_v17 = vsub.f32 %v2188_v13, %v560_v16  ;;  %v580_v19 = vand.u32 2147483647, %v579_v15  ;;  %v562_v20 = vadd.f32 %v560_v16, %v2188_v13 }
  0xf5   : > { %v564_v21 = vand.u32 2147483647, %v563_v17  ;;  %v581_v22 = vmul.f32 %v580_v19, %v578_v18 }
  0xf7   : > { %v565_v23 = vmul.f32 %v564_v21, %v562_v20  ;;  %1761 = vrsqrt.f32 %v581_v22  ;;  %v596_v24 = vpop.permute.xlu1 %595  ;;  %vm584_vm0 = vcmp.eq.f32.partialorder %v581_v22, inf  ;;  %v587_v31 = vand.u32 2147483648, %v581_v22 }
  0xf8   : > { %v598_v27 = vmul.f32 %v596_v24, %v2199_v25  ;;  %vm586_vm1 = vcmp.eq.f32.partialorder %v581_v22, 0.0 }
  0xf9   : > { %1763 = vrsqrt.f32 %v565_v23  ;;  %vm568_vm2 = vcmp.eq.f32.partialorder %v565_v23, inf  ;;  %v571_v35 = vand.u32 2147483648, %v565_v23  ;;  %vm570_vm3 = vcmp.eq.f32.partialorder %v565_v23, 0.0 }
  0xfa   : > { %v1590_v38 = vadd.f32 -1.0, %v598_v27  ;;  %v603_v42 = vmul.f32 %v598_v27, %v596_v24 }
  0xfc   : > { %v602_v44 = vmul.f32 %v1590_v38, %v1590_v38 }
 0x101   : > { %v1762_v26 = vpop.eup %1761 }
 0x102   : > { %v583_v29 = vmul.f32 %v1762_v26, %v581_v22 }
 0x103   : > { %v1764_v28 = vpop.eup %1763 }
 0x104   : > { %v567_v33 = vmul.f32 %v1764_v28, %v565_v23  ;;  %v585_v34 = vsel %vm584_vm0, %v581_v22, %v583_v29 }
 0x105   : > { %v588_v36 = vsel %vm586_vm1, %v587_v31, %v585_v34 }
 0x106   : > { %v569_v37 = vsel %vm568_vm2, %v565_v23, %v567_v33  ;;  %v615_v39 = vmul.f32 %v613_v30, %v588_v36  }
 0x107   : > { %v572_v40 = vsel %vm570_vm3, %v571_v35, %v569_v37 }
 0x108   : > { %v600_v41 = vmul.f32 %v588_v36, %v572_v40  ;;  %v610_v43 = vmul.f32 %v609_v32, %v572_v40  }
 0x10a   : > { %v604_v45 = vmul.f32 %v603_v42, %v600_v41  ;;  %v611_v46 = vmul.f32 %v600_v41, %v596_v24  ;;  %v616_v47 = vsub.f32 %v2199_v25, %v600_v41  }
 0x10c   : > { %v605_v49 = vsub.f32 %v602_v44, %v604_v45  ;;  %v612_v50 = vsub.f32 %v1590_v38, %v611_v46 }
 0x10e   : > { %v607_v51 = vmul.f32 %v606_v48, %v605_v49   ;;  %v614_v52 = vmul.f32 %v613_v30, %v612_v50  }
 0x10f LB: >> { %v1978_v53 = vmov 0   ;;  %s628_s23 = ssub.s32 4, %s1969_s18  ;;  %v1979_v48 = vmov 683565275   ;;  %s622_s18 = sadd.s32 1, %s1969_s18   ;;  %s1969_s18 = sphi %s2217_s18, %s622_s18   ;;  %v1965_v51 = vphi %v607_v51, %v2676_v51   ;;  %v1961_v43 = vphi %v610_v43, %v1307_v43   ;;  %v1957_v52 = vphi %v614_v52, %v1308_v52   ;;  %v1953_v39 = vphi %v615_v39, %v1309_v39   ;;  %v1949_v47 = vphi %v616_v47, %v1310_v47  }
 0x110   : >> { %1765 = vset.pattern.permute.xlu0 %v1978_v53  ;;  %1766 = vset.pattern.permute.xlu1 %v1978_v53  ;;  %s2240_s24 = sadd.s32 %s628_s23, %s531_s21  ;;  %p619_p8 = scmp.ge.s32.totalorder %s622_s18, 5  }
 0x111   : >> { %s633_s27 = sld [smem:[#allocation9 + %s2240_s24]] }
 0x112   : >> { %s634_s25 = sld [smem:[#allocation11 + %s2240_s24]] }
 0x113   : >> { %s631_s20 = sld [smem:[#allocation6 + %s2240_s24]] }
 0x114   : >> { %s630_s30 = sld [smem:[#allocation4 + %s2240_s24]] }
 0x115   : >> { %s2426_s11 = sld [smem:[#allocation8 + %s2240_s24]] }
 0x116   : >> { %s2429_s16 = sld [smem:[#allocation12 + %s2240_s24]] }
 0x117   : >> { %v636_v54 = vstv %s633_s27 }
 0x118   : >> { %v637_v55 = vmul.f32 %v636_v54, %v2170_v1  ;;  %v638_v56 = vstv %s634_s25  ;;  %v1980_v54 = vmov 2475754826  }
 0x119   : >> { %v640_v57 = vstv %s631_s20  ;;  %v639_v58 = vmul.f32 %v638_v56, %v2170_v1  ;;  %v1981_v56 = vmov 2131351028  }
 0x11a   : >> { %652 = vperm.xlu0 %1765, %v637_v55   ;;  %v641_v59 = vmul.f32 %v640_v57, %v2180_v3  ;;  %v2261_v14 = vstv %s630_s30 }
 0x11b   : >> { %s1166_s29 = smul.f32 %s2426_s11, %s2426_s11 }
 0x11c   : >> { %v642_v60 = vmul.f32 2.0, %v641_v59  ;;  %s1167_s19 = smul.f32 %s2429_s16, %s2429_s16 }
 0x11e   : >> { %668 = vperm.xlu0 %1765, %v639_v58   ;;  %v643_v61 = vmul.f32 %v642_v60, %v641_v59  ;;  %v1982_v58 = vmov 2102212464   ;;  %v1983_v60 = vmov 920167782  }
 0x120   : >> { %646 = vperm.xlu1 %1766, %v643_v61  }
 0x199   : >> { %v2248_v62 = vpop.permute.xlu0 %652 }
 0x19a   : >> { %v656_v63 = vsub.f32 %v2188_v13, %v2248_v62  ;;  %v655_v0 = vadd.f32 %v2248_v62, %v2188_v13  ;;  %vm694_vm6 = vcmp.gt.f32.partialorder %v2188_v13, %v2248_v62 }
 0x19c   : >> { %v657_v2 = vand.u32 2147483647, %v656_v63 }
 0x19d   : >> { %v2254_v4 = vpop.permute.xlu0 %668 }
 0x19e   : >> { %v658_v5 = vmul.f32 %v657_v2, %v655_v0  ;;  %v672_v6 = vsub.f32 %v2188_v13, %v2254_v4  ;;  %v671_v7 = vadd.f32 %v2254_v4, %v2188_v13  ;;  %vm923_vm11 = vcmp.gt.f32.partialorder %v2188_v13, %v2254_v4 }
 0x1a0   : >> { %1767 = vrsqrt.f32 %v658_v5  ;;  %v673_v8 = vand.u32 2147483647, %v672_v6  ;;  %vm661_vm4 = vcmp.eq.f32.partialorder %v658_v5, inf  ;;  %v664_v12 = vand.u32 2147483648, %v658_v5 }
 0x1a1   : >> { %vm663_vm5 = vcmp.eq.f32.partialorder %v658_v5, 0.0 }
 0x1a2   : >> { %v674_v9 = vmul.f32 %v673_v8, %v671_v7  ;;  %v1984_v7 = vmov 1326507024  }
 0x1a4   : >> { %1769 = vrsqrt.f32 %v674_v9  ;;  %vm677_vm7 = vcmp.eq.f32.partialorder %v674_v9, inf  ;;  %v680_v24 = vand.u32 2147483648, %v674_v9  ;;  %vm679_vm8 = vcmp.eq.f32.partialorder %v674_v9, 0.0 }
 0x1aa   : >> { %v1768_v10 = vpop.eup %1767 }
 0x1ab   : >> { %v660_v11 = vmul.f32 %v1768_v10, %v658_v5 }
 0x1ad   : >> { %v662_v15 = vsel %vm661_vm4, %v658_v5, %v660_v11 }
 0x1ae   : >> { %v2263_v16 = vsel %vm663_vm5, %v664_v12, %v662_v15  ;;  %v1770_v17 = vpop.eup %1769 }
 0x1af   : >> { %v2267_v18 = vmul.f32 %v2261_v14, %v2263_v16  ;;  %v676_v19 = vmul.f32 %v1770_v17, %v674_v9  ;;  %vm685_vm9 = vcmp.gt.f32.partialorder %v2263_v16, 0.0 }
 0x1b0   : >> { %v686_v36 = vsel %vm685_vm9, %v2263_v16, 1.0 }
 0x1b1   : >> { %v695_v20 = vand.u32 2147483647, %v2267_v18  ;;  %v698_v21 = vand.u32 2139095040, %v2267_v18  ;;  %v902_v22 = vsel %vm694_vm6, %v2267_v18, 0.0  ;;  %v678_v23 = vsel %vm677_vm7, %v674_v9, %v676_v19 }
 0x1b2   : >> { %v903_v27 = vsub.f32 0.0, %v902_v22  ;;  %v2279_v29 = vsel %vm679_vm8, %v680_v24, %v678_v23  ;;  %vm697_vm9 = vcmp.lt.s32.totalorder %v2267_v18, 0 }
 0x1b3   : >> { %v699_v26 = vshrl.u32 %v698_v21, 23  ;;  %v702_v28 = vand.u32 8388607, %v695_v20  ;;  %v2283_v32 = vmul.f32 %v2261_v14, %v2279_v29  ;;  %vm689_vm12 = vcmp.gt.f32.partialorder %v2279_v29, 0.0 }
 0x1b4   : >> { %v904_v31 = vmul.f32 1.442695, %v903_v27 }
 0x1b5   : >> { %v1591_v30 = vadd.s32 4294967169, %v699_v26  ;;  %v703_v34 = vor.u32 8388608, %v702_v28  ;;  %v927_v35 = vand.u32 2139095040, %v2283_v32  ;;  %v1131_v40 = vsel %vm923_vm11, %v2283_v32, 0.0 }
 0x1b6   : >> { %1771 = vpow2.f32 %v904_v31  ;;  %v924_v45 = vand.u32 2147483647, %v2283_v32  ;;  %v1132_v53 = vsub.f32 0.0, %v1131_v40 }
 0x1b7   : >> { %v705_v33 = vadd.s32 1, %v1591_v30  ;;  %v928_v38 = vshrl.u32 %v927_v35, 23  ;;  %1773 = vrcp.f32 %v686_v36  ;;  %v2294_v44 = vshll.u32 %v703_v34, 8 }
 0x1b9   : >> { %vm706_vm10 = vcmp.gt.s32.totalorder %v705_v33, 0  ;;  %v1599_v50 = vadd.s32 4294967169, %v928_v38 }
 0x1ba   : >> { %v707_v37 = vsel %vm706_vm10, %v705_v33, 0  ;;  %vm696_vm10 = vcmp.le.f32.partialorder %v695_v20, 0.7853982 }
 0x1bb   : >> { %v708_v41 = vshrl.u32 %v707_v37, 5  ;;  %v709_v42 = vand.u32 31, %v707_v37  ;;  %v934_v21 = vadd.s32 1, %v1599_v50 }
 0x1bd   : >> { %v710_v46 = vsub.s32 32, %v709_v42  ;;  %v712_v49 = vshll.u32 %v1979_v48, %v709_v42  ;;  %v715_v55 = vshll.u32 %v1980_v54, %v709_v42  ;;  %v718_v57 = vshll.u32 %v1981_v56, %v709_v42 }
 0x1be   : >> { %v721_v59 = vshll.u32 %v1982_v58, %v709_v42  ;;  %v724_v61 = vshll.u32 %v1983_v60, %v709_v42  ;;  %vm727_vm13 = vcmp.lt.s32.totalorder %v708_v41, 1  ;;  %vm729_vm14 = vcmp.lt.s32.totalorder %v708_v41, 3 }
 0x1bf   : >> { %v713_v63 = vshrl.u32 %v1980_v54, %v710_v46  ;;  %v716_v0 = vshrl.u32 %v1981_v56, %v710_v46  ;;  %v719_v2 = vshrl.u32 %v1982_v58, %v710_v46  ;;  %v711_v5 = vshrl.u32 %v1979_v48, %v710_v46 }
 0x1c0   : >> { %v722_v6 = vshrl.u32 %v1983_v60, %v710_v46  ;;  %v725_v8 = vshrl.u32 %v1984_v7, %v710_v46  ;;  %v2308_v9 = vpop.eup %1771  ;;  %vm730_vm15 = vcmp.lt.s32.totalorder %v708_v41, 4  ;;  %vm728_vm0 = vcmp.lt.s32.totalorder %v708_v41, 2 }
 0x1c1   : >> { %v714_v10 = vor.u32 %v713_v63, %v712_v49  ;;  %v717_v11 = vor.u32 %v716_v0, %v715_v55  ;;  %v720_v12 = vor.u32 %v719_v2, %v718_v57  ;;  %v906_v19 = vmul.f32 %v2308_v9, %v2308_v9  ;;  %v2318_v36 = vpop.eup %1773 }
 0x1c2   : >> { %v723_v15 = vor.u32 %v722_v6, %v721_v59  ;;  %v726_v17 = vor.u32 %v725_v8, %v724_v61  ;;  %vm935_vm1 = vcmp.gt.s32.totalorder %v934_v21, 0  ;;  %v1133_v59 = vmul.f32 1.442695, %v1132_v53 }
 0x1c3   : >> { %v731_v22 = vsel %vm727_vm13, %v711_v5, %v714_v10  ;;  %v732_v23 = vsel %vm730_vm15, %v720_v12, 2102212464  ;;  %v735_v24 = vsel %vm727_vm13, %v714_v10, %v717_v11  ;;  %v739_v26 = vsel %vm727_vm13, %v717_v11, %v720_v12 }
 0x1c4   : >> { %v733_v27 = vsel %vm729_vm14, %v717_v11, %v732_v23  ;;  %v736_v28 = vsel %vm730_vm15, %v723_v15, 920167782  ;;  %v740_v30 = vsel %vm730_vm15, %v726_v17, 1326507024  ;;  %v907_v31 = vadd.f32 1.0, %v906_v19 }
 0x1c5   : >> { %v737_v33 = vsel %vm729_vm14, %v720_v12, %v736_v28  ;;  %v741_v34 = vsel %vm729_vm14, %v723_v15, %v740_v30  ;;  %v909_v35 = vsub.f32 1.0, %v906_v19  ;;  %v734_v37 = vsel %vm728_vm0, %v731_v22, %v733_v27 }
 0x1c6   : >> { %v738_v38 = vsel %vm728_vm0, %v735_v24, %v737_v33  ;;  %v742_v40 = vsel %vm728_vm0, %v739_v26, %v741_v34  ;;  %v908_v42 = vmul.f32 0.5, %v907_v31  ;;  %v690_v61 = vsel %vm689_vm12, %v2279_v29, 1.0 }
 0x1c7   : >> { %v2321_v46 = vmul.u32.u64.low %v2294_v44, %v742_v40  ;;  %v2322_v49 = vmul.u32.u64.high %v2294_v44, %v742_v40, %v2321_v46  ;;  %v2325_v50 = vmul.u32.u64.low %v2294_v44, %v738_v38  ;;  %v2326_v55 = vmul.u32.u64.high %v2294_v44, %v738_v38, %v2325_v50 }
 0x1c8   : >> { %v910_v57 = vmul.f32 0.5, %v909_v35  ;;  %v2332_v41 = vsel %vm694_vm6, %v908_v42, 1.0  ;;  %v936_v63 = vsel %vm935_vm1, %v934_v21, 0  ;;  %v931_v5 = vand.u32 8388607, %v924_v45 }
 0x1c9   : >> { %v938_v6 = vand.u32 31, %v936_v63  ;;  %v750_v8 = vmul.u32 %v2294_v44, %v734_v37  ;;  %vm752_vm2 = vc.u32 %v2322_v49, %v2325_v50  ;;  %v753_v53 = vadd.s32 1, %v2326_v55 }
 0x1ca   : >> { %v914_v0 = vmul.f32 %v2318_v36, %v910_v57  ;;  %v919_v2 = vmul.f32 %v910_v57, %v2263_v16  ;;  %1775 = vpow2.f32 %v1133_v59  ;;  %v937_v12 = vshrl.u32 %v936_v63, 5 }
 0x1cb   : >> { %v939_v15 = vsub.s32 32, %v938_v6  ;;  %v754_v44 = vsel %vm752_vm2, %v753_v53, %v2326_v55  ;;  %v941_v17 = vshll.u32 %v1979_v48, %v938_v6  ;;  %v944_v19 = vshll.u32 %v1980_v54, %v938_v6 }
 0x1cc   : >> { %v2349_v10 = vsel %vm694_vm6, %v914_v0, %v2261_v14  ;;  %v2354_v11 = vsel %vm694_vm6, %v919_v2, 0.0  ;;  %v947_v21 = vshll.u32 %v1981_v56, %v938_v6  ;;  %v755_v22 = vadd.s32 %v754_v44, %v750_v8 }
 0x1cd   : >> { %v942_v23 = vshrl.u32 %v1980_v54, %v939_v15  ;;  %v945_v24 = vshrl.u32 %v1981_v56, %v939_v15  ;;  %v950_v26 = vshll.u32 %v1982_v58, %v938_v6  ;;  %v948_v27 = vshrl.u32 %v1982_v58, %v939_v15 }
 0x1ce   : >> { %v951_v28 = vshrl.u32 %v1983_v60, %v939_v15  ;;  %v953_v30 = vshll.u32 %v1983_v60, %v938_v6  ;;  %v954_v31 = vshrl.u32 %v1984_v7, %v939_v15  ;;  %v756_v33 = vadd.s32 536870912, %v755_v22 }
 0x1cf   : >> { %1777 = vrcp.f32 %v690_v61  ;;  %v943_v34 = vor.u32 %v942_v23, %v941_v17  ;;  %v946_v35 = vor.u32 %v945_v24, %v944_v19  ;;  %v932_v37 = vor.u32 8388608, %v931_v5 }
 0x1d0   : >> { %v949_v38 = vor.u32 %v948_v27, %v947_v21  ;;  %v952_v40 = vor.u32 %v951_v28, %v950_v26  ;;  %v955_v42 = vor.u32 %v954_v31, %v953_v30  ;;  %v2366_v54 = vshrl.u32 %v756_v33, 30 }
 0x1d1   : >> { %v940_v56 = vshrl.u32 %v1979_v48, %v939_v15  ;;  %vm956_vm3 = vcmp.lt.s32.totalorder %v937_v12, 1  ;;  %vm959_vm4 = vcmp.lt.s32.totalorder %v937_v12, 4  ;;  %vm957_vm5 = vcmp.lt.s32.totalorder %v937_v12, 2 }
 0x1d2   : >> { %vm958_vm6 = vcmp.lt.s32.totalorder %v937_v12, 3  ;;  %v964_v58 = vsel %vm956_vm3, %v943_v34, %v946_v35  ;;  %v965_v46 = vsel %vm959_vm4, %v952_v40, 920167782  ;;  %v758_v60 = vshll.u32 %v2366_v54, 30 }
 0x1d3   : >> { %v961_v7 = vsel %vm959_vm4, %v949_v38, 2102212464  ;;  %v966_v55 = vsel %vm958_vm6, %v949_v38, %v965_v46  ;;  %v968_v57 = vsel %vm956_vm3, %v946_v35, %v949_v38  ;;  %v969_v63 = vsel %vm959_vm4, %v955_v42, 1326507024 }
 0x1d4   : >> { %v1776_v59 = vpop.eup %1775  ;;  %v967_v61 = vsel %vm957_vm5, %v964_v58, %v966_v55  ;;  %v972_v0 = vshll.u32 %v932_v37, 8  ;;  %v759_v2 = vsub.s32 %v755_v22, %v758_v60  ;;  %v960_v5 = vsel %vm956_vm3, %v940_v56, %v943_v34 }
 0x1d5   : >> { %v970_v6 = vsel %vm958_vm6, %v952_v40, %v969_v63  ;;  %v962_v48 = vsel %vm958_vm6, %v946_v35, %v961_v7  ;;  %v2375_v17 = vmul.f32 %v1776_v59, %v1776_v59  ;;  %v2381_v23 = vmul.f32 %v1776_v59, %v2308_v9 }
 0x1d6   : >> { %v971_v8 = vsel %vm957_vm5, %v968_v57, %v970_v6  ;;  %v2372_v53 = vmul.u32.u64.low %v972_v0, %v967_v61  ;;  %v2373_v15 = vmul.u32.u64.high %v972_v0, %v967_v61, %v2372_v53  ;;  %v761_v44 = vsub.s32 0, %v759_v2 }
 0x1d7   : >> { %v2377_v19 = vmul.u32.u64.low %v972_v0, %v971_v8  ;;  %v2378_v21 = vmul.u32.u64.high %v972_v0, %v971_v8, %v2377_v19  ;;  %v963_v26 = vsel %vm957_vm5, %v960_v5, %v962_v48  ;;  %v1138_v28 = vsub.f32 1.0, %v2375_v17 }
 0x1d8   : >> { %v1592_v22 = vmin.u32 %v761_v44, %v759_v2  ;;  %v982_v27 = vadd.s32 1, %v2373_v15  ;;  %v979_v31 = vmul.u32 %v972_v0, %v963_v26  ;;  %v751_v58 = vadd.s32 %v2325_v50, %v2322_v49 }
 0x1d9   : >> { %v2383_v24 = vpop.eup %1777  ;;  %vm981_vm7 = vc.u32 %v2378_v21, %v2372_v53  ;;  %v1139_v33 = vmul.f32 0.5, %v1138_v28  ;;  %vm787_vm13 = vweird.f32 %v2267_v18  ;;  %vm926_vm14 = vcmp.lt.s32.totalorder %v2283_v32, 0 }
 0x1da   : >> { %v763_v30 = vclz %v1592_v22  ;;  %v983_v35 = vsel %vm981_vm7, %v982_v27, %v2373_v15  ;;  %v781_v15 = vsub.s32 4, %v2366_v54  ;;  %vm2420_vm15 = vcmp.le.f32.partialorder %v924_v45, 0.7853982 }
 0x1db   : >> { %v984_v37 = vadd.s32 %v983_v35, %v979_v31  ;;  %v1143_v9 = vmul.f32 %v2383_v24, %v1139_v33  ;;  %v1148_v38 = vmul.f32 %v1139_v33, %v2279_v29  ;;  %v980_v31 = vadd.s32 %v2372_v53, %v2378_v21 }
 0x1dc   : >> { %v1593_v34 = vadd.s32 4294967294, %v763_v30  ;;  %vm693_vm6 = vcmp.lt.f32.partialorder %v2188_v13, %v2248_v62  ;;  %vm922_vm7 = vcmp.lt.f32.partialorder %v2188_v13, %v2254_v4 }
 0x1dd   : >> { %v985_v40 = vadd.s32 536870912, %v984_v37  ;;  %v2396_v42 = vsel %vm923_vm11, %v1143_v9, %v2261_v14  ;;  %v2401_v56 = vsel %vm923_vm11, %v1148_v38, 0.0 }
 0x1de   : >> { %vm1594_vm8 = vcmp.lt.s32.totalorder %v1593_v34, 0 }
 0x1df   : >> { %v766_v12 = vsel %vm1594_vm8, 0, %v1593_v34  ;;  %v2405_v7 = vshrl.u32 %v985_v40, 30 }
 0x1e0   : >> { %v767_v46 = vsub.s32 32, %v766_v12  ;;  %v771_v60 = vsub.s32 4294967266, %v766_v12  ;;  %v768_v55 = vshll.u32 %v759_v2, %v766_v12  ;;  %v782_v2 = vsel %vm697_vm9, %v781_v15, %v2366_v54 }
 0x1e1   : >> { %v987_v61 = vshll.u32 %v2405_v7, 30  ;;  %v784_v28 = vsel %vm696_vm10, 0, %v782_v2  ;;  %v2445_v2 = vpop.permute.xlu1 %646 }
 0x1e2   : >> { %v769_v57 = vshrl.u32 %v751_v58, %v767_v46  ;;  %v772_v59 = vadd.s32 127, %v771_v60  ;;  %v788_v54 = vadd.s32 3, %v784_v28  ;;  %v892_v58 = vand.u32 3, %v784_v28 }
 0x1e3   : >> { %v988_v0 = vsub.s32 %v984_v37, %v987_v61  ;;  %v649_v28 = vmul.f32 %v2445_v2, %v2199_v25 }
 0x1e4   : >> { %v770_v63 = vor.u32 %v769_v57, %v768_v55  ;;  %v773_v14 = vshll.u32 %v772_v59, 23  ;;  %v789_v40 = vand.u32 3, %v788_v54  ;;  %v917_v57 = vsub.f32 0.0, %v2263_v16 }
 0x1e5   : >> { %v990_v6 = vsub.s32 0, %v988_v0  ;;  %vm894_vm1 = vcmp.eq.s32.totalorder %v892_v58, 0  ;;  %vm897_vm2 = vcmp.eq.s32.totalorder %v892_v58, 2  ;;  %vm893_vm5 = vcmp.lt.s32.totalorder %v892_v58, 2 }
 0x1e6   : >> { %v774_v5 = vor.u32 4788187, %v773_v14  ;;  %v777_v8 = vcvt.s32.f32 %v770_v63  ;;  %v1010_v63 = vsub.s32 4, %v2405_v7  ;;  %vm794_vm0 = vcmp.eq.s32.totalorder %v789_v40, 2 }
 0x1e7   : >> { %v1600_v44 = vmin.u32 %v990_v6, %v988_v0  ;;  %vm791_vm3 = vcmp.eq.s32.totalorder %v789_v40, 0  ;;  %vm790_vm4 = vcmp.lt.s32.totalorder %v789_v40, 2  ;;  %v2484_v54 = vstv %s2426_s11 }
 0x1e8   : >> { %v775_v48 = vand.u32 2147483647, %v774_v5 }
 0x1e9   : >> { %v992_v50 = vclz %v1600_v44  ;;  %v1011_v44 = vsel %vm926_vm14, %v1010_v63, %v2405_v7 }
 0x1ea   : >> { %v778_v49 = vmul.f32 %v777_v8, %v775_v48  ;;  %v1013_v62 = vsel %vm2420_vm15, 0, %v1011_v44 }
 0x1eb   : >> { %v1601_v22 = vadd.s32 4294967294, %v992_v50 }
 0x1ec   : >> { %v779_v19 = vxor.u32 2147483648, %v778_v49 }
 0x1ed   : >> { %vm1602_vm12 = vcmp.lt.s32.totalorder %v1601_v22, 0 }
 0x1ee   : >> { %v780_v26 = vsel %vm697_vm9, %v779_v19, %v778_v49  ;;  %v995_v30 = vsel %vm1602_vm12, 0, %v1601_v22 }
 0x1ef   : >> { %v783_v27 = vsel %vm696_vm10, %v2267_v18, %v780_v26  ;;  %v996_v33 = vsub.s32 32, %v995_v30  ;;  %v1000_v34 = vsub.s32 4294967266, %v995_v30  ;;  %v997_v35 = vshll.u32 %v988_v0, %v995_v30 }
 0x1f0   : >> { %1779 = vcosq.f32 %v783_v27  ;;  %v2464_v30 = vstv %s2429_s16 }
 0x1f1   : >> { %1781 = vsinq.f32 %v783_v27  ;;  %v998_v37 = vshrl.u32 %v980_v31, %v996_v33  ;;  %v1001_v9 = vadd.s32 127, %v1000_v34  ;;  %v2467_v31 = vmul.f32 2.0, %v2199_v25 }
 0x1f2   : >> { %v2469_v33 = vadd.f32 -1.0, %v649_v28 }
 0x1f3   : >> { %v999_v38 = vor.u32 %v998_v37, %v997_v35  ;;  %v1002_v12 = vshll.u32 %v1001_v9, 23  ;;  %v1121_v35 = vand.u32 3, %v1013_v62  ;;  %v1136_v37 = vadd.f32 1.0, %v2375_v17 }
 0x1f4   : >> { %v2481_v9 = vmul.f32 -2.0, %v2199_v25  ;;  %v2493_v17 = vmul.f32 %v2469_v33, %v2469_v33 }
 0x1f5   : >> { %v1003_v20 = vor.u32 4788187, %v1002_v12  ;;  %v1006_v60 = vcvt.s32.f32 %v999_v38  ;;  %v1162_v12 = vadd.f32 %v2469_v33, %v649_v28  ;;  %vm1126_vm9 = vcmp.eq.s32.totalorder %v1121_v35, 2 }
 0x1f6   : >> { %vm1123_vm12 = vcmp.eq.s32.totalorder %v1121_v35, 0 }
 0x1f7   : >> { %v1004_v46 = vand.u32 2147483647, %v1003_v20  ;;  %v2488_v20 = vmul.f32 %v649_v28, %v2445_v2 }
 0x1f9   : >> { %v1007_v61 = vmul.f32 %v1006_v60, %v1004_v46  ;;  %v1164_v46 = vmul.f32 %v2469_v33, %v649_v28  ;;  %v2497_v60 = vmul.f32 %v2469_v33, %v2199_v25 }
 0x1fa   : >> { %v1780_v55 = vpop.eup %1779 }
 0x1fb   : >> { %v1782_v53 = vpop.eup %1781  ;;  %v795_v21 = vxor.u32 2147483648, %v1780_v55  ;;  %v1008_v5 = vxor.u32 2147483648, %v1007_v61 }
 0x1fc   : >> { %v792_v14 = vxor.u32 2147483648, %v1782_v53 }
 0x1fd   : >> { %v796_v16 = vsel %vm794_vm0, %v795_v21, %v1782_v53  ;;  %v899_v0 = vsel %vm897_vm2, %v795_v21, %v1782_v53  ;;  %v1009_v15 = vsel %vm926_vm14, %v1008_v5, %v1007_v61  ;;  %vm1122_vm14 = vcmp.lt.s32.totalorder %v1121_v35, 2 }
 0x1fe   : >> { %v793_v45 = vsel %vm791_vm3, %v1780_v55, %v792_v14  ;;  %v896_v6 = vsel %vm894_vm1, %v1780_v55, %v792_v14  ;;  %v1012_v19 = vsel %vm2420_vm15, %v2283_v32, %v1009_v15  ;;  %vm1016_vm15 = vweird.f32 %v2283_v32 }
 0x1ff   : >> { %v797_v48 = vsel %vm790_vm4, %v793_v45, %v796_v16  ;;  %v900_v8 = vsel %vm893_vm5, %v896_v6, %v899_v0  ;;  %1783 = vcosq.f32 %v1012_v19  ;;  %v1146_v16 = vsub.f32 0.0, %v2279_v29 }
 0x200   : >> { %v798_v49 = vsel %vm787_vm13, nan, %v797_v48  ;;  %v901_v50 = vsel %vm787_vm13, nan, %v900_v8  ;;  %1785 = vsinq.f32 %v1012_v19  ;;  %v1220_v6 = vmul.f32 2.0, %v2488_v20 }
 0x201   : >> { %v2448_v22 = vsel %vm693_vm6, %v901_v50, %v2332_v41  ;;  %v913_v7 = vmul.f32 %v2318_v36, %v798_v49  ;;  %v918_v26 = vmul.f32 %v917_v57, %v798_v49  ;;  %v1017_v41 = vadd.s32 3, %v1013_v62 }
 0x202   : >> { %v2461_v36 = vstv %s1166_s29  ;;  %v1137_v57 = vmul.f32 0.5, %v1136_v37  ;;  %v2511_v32 = vmul.f32 %v2488_v20, %v2488_v20  ;;  %v2518_v50 = vmul.f32 %v2469_v33, %v2488_v20 }
 0x203   : >> { %v916_v18 = vsel %vm693_vm6, %v913_v7, %v2349_v10  ;;  %v921_v27 = vsel %vm693_vm6, %v918_v26, %v2354_v11  ;;  %v2473_v10 = vmul.f32 %v2199_v25, %v2199_v25  ;;  %v2475_v11 = vstv %s1167_s19 }
 0x204   : >> { %v1018_v34 = vand.u32 3, %v1017_v41  ;;  %v1140_v45 = vsel %vm923_vm11, %v1137_v57, 1.0  ;;  %v1170_v7 = vmul.f32 2.0, %v1164_v46  ;;  %v1175_v26 = vmul.f32 %v2493_v17, %v2199_v25 }
 0x205   : > { %vm1319_vm0 = vcmask (%p619_p8), 7168  }
 0x206   : >> { %vm1023_vm8 = vcmp.eq.s32.totalorder %v1018_v34, 2  ;;  %vm1020_vm10 = vcmp.eq.s32.totalorder %v1018_v34, 0  ;;  %vm1019_vm13 = vcmp.lt.s32.totalorder %v1018_v34, 2 }
 0x209   : >> { %v1784_v38 = vpop.eup %1783 }
 0x20a   : >> { %v1786_v40 = vpop.eup %1785  ;;  %v1024_v58 = vxor.u32 2147483648, %v1784_v38 }
 0x20b   : >> { %v1021_v55 = vxor.u32 2147483648, %v1786_v40 }
 0x20c   : >> { %v1025_v53 = vsel %vm1023_vm8, %v1024_v58, %v1786_v40  ;;  %v1128_v21 = vsel %vm1126_vm9, %v1024_v58, %v1786_v40  ;;  %v1226_v40 = vmul.f32 %v2493_v17, %v2493_v17  ;;  %v1232_v58 = vmul.f32 %v1164_v46, %v1162_v12 }
 0x20d   : >> { %v1022_v59 = vsel %vm1020_vm10, %v1784_v38, %v1021_v55  ;;  %v1125_v61 = vsel %vm1123_vm12, %v1784_v38, %v1021_v55  ;;  %v1221_v38 = vmul.f32 %v1220_v6, %v2493_v17 }
 0x20e   : >> { %v1026_v63 = vsel %vm1019_vm13, %v1022_v59, %v1025_v53  ;;  %v1129_v14 = vsel %vm1122_vm14, %v1125_v61, %v1128_v21  ;;  %v1237_v59 = vmul.f32 %v2469_v33, %v2493_v17 }
 0x20f   : >> { %v1027_v0 = vsel %vm1016_vm15, nan, %v1026_v63  ;;  %v1130_v5 = vsel %vm1016_vm15, nan, %v1129_v14 }
 0x210   : >> { %v1141_v48 = vsel %vm922_vm7, %v1130_v5, %v1140_v45  ;;  %v1142_v8 = vmul.f32 %v2383_v24, %v1027_v0  ;;  %v1147_v15 = vmul.f32 %v1146_v16, %v1027_v0 }
 0x211   : >> { %v2514_v29 = vmul.f32 %v1141_v48, %v2448_v22  ;;  %v1155_v44 = vmul.f32 %v1141_v48, %v916_v18  ;;  %v1156_v49 = vmul.f32 %v1141_v48, %v921_v27 }
 0x212   : >> { %v1145_v19 = vsel %vm922_vm7, %v1142_v8, %v2396_v42  ;;  %v1150_v24 = vsel %vm922_vm7, %v1147_v15, %v2401_v56 }
 0x213   : >> { %v1153_v62 = vmul.f32 %v1145_v19, %v2448_v22  ;;  %v1154_v28 = vmul.f32 %v1150_v24, %v2448_v22  ;;  %v2532_v41 = vmul.f32 %v1145_v19, %v921_v27  ;;  %v1158_v34 = vmul.f32 %v1150_v24, %v921_v27 }
 0x214   : >> { %v2534_v35 = vmul.f32 %v1145_v19, %v916_v18  ;;  %v1160_v37 = vmul.f32 %v1150_v24, %v916_v18  ;;  %v1168_v42 = vsub.f32 %v2381_v23, %v2514_v29  ;;  %v1190_v4 = vmul.f32 %v1155_v44, %v2199_v25 }
 0x215   : >> { %v1178_v56 = vmul.f32 %v1153_v62, %v2199_v25  ;;  %v1183_v57 = vmul.f32 %v1158_v34, %v2445_v2  ;;  %v1173_v21 = vmul.f32 %v2488_v20, %v1158_v34  ;;  %v1202_v5 = vmul.f32 %v2488_v20, %v1154_v28 }
 0x216   : >> { %v1191_v22 = vsub.f32 %v1154_v28, %v1190_v4  ;;  %v1194_v55 = vmul.f32 %v2467_v31, %v1168_v42  ;;  %v1273_v27 = vsub.f32 0.0, %v1160_v37  ;;  %v1171_v53 = vmul.f32 %v1170_v7, %v1168_v42 }
 0x217   : >> { %v1179_v18 = vsub.f32 %v1178_v56, %v1156_v49  ;;  %v1197_v14 = vmul.f32 %v2473_v10, %v2534_v35  ;;  %v1182_v46 = vmul.f32 %v1168_v42, %v1162_v12  ;;  %v1186_v8 = vmul.f32 %v2497_v60, %v2534_v35 }
 0x218   : >> { %v1192_v61 = vmul.f32 %v1191_v22, %v2464_v30  ;;  %v1195_v63 = vadd.f32 %v1194_v55, %v1158_v34  ;;  %v1274_v31 = vmul.f32 %v1961_v43, %v1273_v27  ;;  %v1172_v0 = vsub.f32 %v2514_v29, %v1171_v53 }
 0x219   : >> { %v2552_v16 = vmul.f32 %v2464_v30, %v1179_v18  ;;  %v1184_v48 = vadd.f32 %v1183_v57, %v1182_v46  ;;  %v1176_v12 = vmul.f32 %v1175_v26, %v2534_v35  ;;  %v1203_v19 = vmul.f32 %v2493_v17, %v1155_v44 }
 0x21a   : >> { %v1198_v45 = vadd.f32 %v1197_v14, %v1195_v63  ;;  %v1272_v6 = vmul.f32 %v1965_v51, %v1192_v61  ;;  %v1284_v15 = vmul.f32 %v1961_v43, %v1192_v61  ;;  %v1174_v10 = vsub.f32 %v1172_v0, %v1173_v21 }
 0x21b   : >> { %v1187_v37 = vadd.f32 %v1186_v8, %v1184_v48  ;;  %v1207_v4 = vmul.f32 %v1154_v28, %v2445_v2  ;;  %v1204_v22 = vsub.f32 %v1202_v5, %v1203_v19  ;;  %v1208_v55 = vmul.f32 %v2469_v33, %v1155_v44 }
 0x21c   : >> { %v1199_v24 = vsub.f32 0.0, %v1198_v45  ;;  %v2563_v7 = vadd.f32 %v1274_v31, %v1272_v6  ;;  %v2566_v56 = vsub.f32 %v1174_v10, %v1176_v12  ;;  %v1213_v60 = vmul.f32 %v2493_v17, %v1153_v62 }
 0x21d   : >> { %v1188_v57 = vsub.f32 0.0, %v1187_v37  ;;  %v1214_v26 = vmul.f32 %v2488_v20, %v1156_v49  ;;  %v1217_v18 = vmul.f32 %v2469_v33, %v1153_v62  ;;  %v1206_v53 = vmul.f32 %v2484_v54, %v1204_v22 }
 0x21e   : >> { %v1201_v27 = vmul.f32 %v2475_v11, %v1199_v24  ;;  %v1209_v21 = vsub.f32 %v1207_v4, %v1208_v55  ;;  %v1210_v28 = vsub.f32 %v2514_v29, %v2566_v56  ;;  %v1218_v61 = vmul.f32 %v1156_v49, %v2445_v2 }
 0x21f   : >> { %v1189_v44 = vmul.f32 %v1188_v57, %v2464_v30  ;;  %v1215_v17 = vsub.f32 %v1213_v60, %v1214_v26  ;;  %v1222_v14 = vmul.f32 %v1221_v38, %v1168_v42  ;;  %v1252_v11 = vmul.f32 %v1965_v51, %v2552_v16 }
 0x220   : >> { %v1283_v63 = vmul.f32 %v1965_v51, %v1201_v27  ;;  %v1211_v20 = vmul.f32 2.0, %v1210_v28  ;;  %v1219_v46 = vsub.f32 %v1217_v18, %v1218_v61  ;;  %v1224_v33 = vmul.f32 %v2511_v32, %v1158_v34 }
 0x221   : >> { %v1216_v31 = vmul.f32 %v1215_v17, %v2484_v54  ;;  %v1233_v0 = vmul.f32 %v1232_v58, %v1168_v42  ;;  %v1235_v5 = vmul.f32 %v2518_v50, %v1158_v34  ;;  %v1227_v30 = vmul.f32 %v1226_v40, %v2534_v35 }
 0x222   : >> { %v1285_v62 = vadd.f32 %v1284_v15, %v1283_v63  ;;  %v1212_v2 = vadd.f32 %v1211_v20, %v2381_v23  ;;  %v1225_v49 = vadd.f32 %v1224_v33, %v1222_v14  ;;  %v1242_v38 = vmul.f32 %v1965_v51, %v2566_v56 }
 0x223   : >> { %v1236_v45 = vadd.f32 %v1235_v5, %v1233_v0  ;;  %v1238_v6 = vmul.f32 %v1237_v59, %v2534_v35  ;;  %v1243_v48 = vmul.f32 %v1961_v43, %v1206_v53  ;;  %v1253_v32 = vmul.f32 %v1961_v43, %v2514_v29 }
 0x224   : >> { %v1258_v42 = vsub.f32 0.0, %v2532_v41  ;;  %v1228_v58 = vadd.f32 %v1227_v30, %v1225_v49  ;;  %v1255_v50 = vmul.f32 %v1219_v46, %v2481_v9  ;;  %v1263_v23 = vmul.f32 %v1965_v51, %v1189_v44 }
 0x225   : >> { %v1239_v34 = vadd.f32 %v1238_v6, %v1236_v45  ;;  %v1244_v40 = vadd.f32 %v1243_v48, %v1242_v38  ;;  %v1254_v8 = vadd.f32 %v1253_v32, %v1252_v11  ;;  %v1264_v15 = vmul.f32 %v1961_v43, %v1209_v21 }
 0x226   : >> { %v1229_v10 = vsub.f32 0.0, %v1228_v58  ;;  %v1256_v35 = vmul.f32 %v1957_v52, %v1255_v50  ;;  %v1266_v59 = vmul.f32 %v1957_v52, %v1212_v2  ;;  %v1276_v24 = vmul.f32 %v1209_v21, %v2481_v9 }
 0x227   : >> { %v1240_v12 = vsub.f32 0.0, %v1239_v34  ;;  %v1265_v19 = vadd.f32 %v1264_v15, %v1263_v23  ;;  %v1259_v41 = vmul.f32 %v1953_v39, %v1258_v42  ;;  %v1286_v51 = vmul.f32 %v1189_v44, %v2481_v9 }
 0x228   : >> { %v1231_v37 = vmul.f32 %v2461_v36, %v1229_v10  ;;  %v1257_v4 = vadd.f32 %v1256_v35, %v1254_v8  ;;  %v1268_v43 = vmul.f32 %v1953_v39, %v1219_v46  ;;  %v1277_v60 = vmul.f32 %v1957_v52, %v1276_v24 }
 0x229   : >> { %v1241_v22 = vmul.f32 %v1240_v12, %v2484_v54  ;;  %v1267_v55 = vadd.f32 %v1266_v59, %v1265_v19  ;;  %v1261_v57 = vmul.f32 %v1949_v47, %v1216_v31  ;;  %v1279_v26 = vmul.f32 %v1953_v39, %v2514_v29 }
 0x22a   : >> { %v1260_v27 = vadd.f32 %v1259_v41, %v1257_v4  ;;  %v1287_v18 = vmul.f32 %v1957_v52, %v1286_v51  ;;  %v1278_v54 = vadd.f32 %v1277_v60, %v2563_v7  ;;  %v1289_v61 = vmul.f32 %v1953_v39, %v2552_v16 }
 0x22b   : >> { %v1245_v36 = vmul.f32 %v1241_v22, %v2481_v9  ;;  %v1269_v21 = vadd.f32 %v1268_v43, %v1267_v55  ;;  %v1270_v28 = vmul.f32 %v1949_v47, %v1241_v22  ;;  %v1281_v29 = vmul.f32 %v1949_v47, %v1206_v53 }
 0x22c   : >> { %v1262_v63 = vadd.f32 %v1261_v57, %v1260_v27  ;;  %v1288_v44 = vadd.f32 %v1287_v18, %v1285_v62  ;;  %v1280_v11 = vadd.f32 %v1279_v26, %v1278_v54  ;;  %v1291_v9 = vmul.f32 %v1949_v47, %v2566_v56 }
 0x22d   : >> { %v1246_v17 = vmul.f32 %v1957_v52, %v1245_v36  ;;  %v1271_v14 = vadd.f32 %v1270_v28, %v1269_v21  ;;  %v1248_v33 = vmul.f32 %v1953_v39, %v1216_v31  ;;  %v1250_v16 = vmul.f32 %v1949_v47, %v1231_v37 }
 0x22e   : >> { %v1290_v20 = vadd.f32 %v1289_v61, %v1288_v44  ;;  %v1282_v0 = vadd.f32 %v1281_v29, %v1280_v11 }
 0x22f   : >> { %v1247_v46 = vadd.f32 %v1246_v17, %v1244_v40 }
 0x230   : >> { %v1292_v7 = vadd.f32 %v1291_v9, %v1290_v20 }
 0x231   : >> { %v1249_v5 = vadd.f32 %v1248_v33, %v1247_v46 }
 0x232   : >> { %1931 = vmaxabs.init.f32.vacc1 %v1282_v0, %v1292_v7 }
 0x233   : >> { %v1251_v2 = vadd.f32 %v1250_v16, %v1249_v5 }
 0x234   : >> { %1932 = vmaxabs.f32.vacc1 %v1271_v14, %v1262_v63 }
 0x236   : >> { %1933 = vmaxabs.f32.vacc1 %v1251_v2, %v1251_v2 }
 0x238   : >> { %v1934_v52 = vmovacc.low.even.vacc1 }
 0x23a   : >> { %vm1302_vm11 = vcmp.lt.f32.partialorder %v1934_v52, 1e-30 }
 0x23b   : >> { %v1303_v62 = vsel %vm1302_vm11, 1.0, %v1934_v52 }
 0x23c   : >> { %1787 = vrcp.f32 %v1303_v62 }
 0x243   : > { %621 = sbr.rel (!%p619_p8) target bundleno = 271 (0x10f), region = 148 }
 0x246   : >> { %v1788_v53 = vpop.eup %1787 }
 0x247   : >> { %v1306_v49 = vmul.f32 %v1788_v53, %v1251_v2   ;;  %v1307_v43 = vmul.f32 %v1788_v53, %v1262_v63   ;;  %v1308_v52 = vmul.f32 %v1788_v53, %v1271_v14   ;;  %v1309_v39 = vmul.f32 %v1788_v53, %v1282_v0  }
 0x248   : >> { %v1310_v47 = vmul.f32 %v1788_v53, %v1292_v7  }
 0x249   : >> { %v2676_v51 = vmov %v1306_v49  ;;  %1311 = vmax.xlane.f32.xlu0 (%p619_p8), %v1306_v49 }
 0x24d   : > { %1313 = vmin.xlane.f32.xlu0 %v1306_v49 }
 0x2d6   : > { %v1312_v56 = vpop.xlane.xlu0 %1311 }
 0x2d7   : > { %1320 = vst.msk [vmem:[#allocation2] sm:$0xff] %vm1319_vm0, %v1312_v56 }
 0x2da   : > { %v1314_v31 = vpop.xlane.xlu0 %1313 }
 0x2db   : > { %1321 = vst.msk [vmem:[#allocation3] sm:$0xff] %vm1319_vm0, %v1314_v31 }
 0x2de   : > { %v1336_v30 = vld [vmem:[#allocation2] sm:$0xff] }
 0x2df   : > { %1338 = vst.msk [vmem:[%s523_s17] sm:$0xff] %vm1319_vm0, %v1336_v30 }
 0x2e2   : > { %v1339_v38 = vld [vmem:[#allocation3] sm:$0xff] }
 0x2e3   : > { %1340 = vst.msk [vmem:[%s530_s22] sm:$0xff] %vm1319_vm0, %v1339_v38 }
 0x2e4 PF: > { %s25_s15 = sadd.s32 1, %s1945_s15   ;;  %s2677_s13 = smov %s1941_s14 }
 0x2e5   : > { %p22_p2 = scmp.ge.s32.totalorder %s25_s15, 4   ;;  %s2678_s14 = smov %s2680_s26 }
 0x2e7   :  { %24 = sbr.rel (!%p22_p2) target bundleno = 5 (0x5), region = 159 }
 0x2ee   :  { %1386 = vsyncpa [#allocation5], 1 }
 0x2ef   :  { %1388 = vsyncpa [#allocation5 + $0x1], 1 }
 0x2f0   :  { %1389 = vsyncpa [#allocation7], 1 }
 0x2f1   :  { %1390 = vsyncpa [#allocation10], 1 }
 0x2f2   :  { %1391 = vsyncpa [#allocation13], 1 }

</bundles_post_ra>
